<compile_context>
chip_gen: v7x
topology: tpu7x:2x2x1
jax: 0.10.0
libtpu: 0.0.40
codegen_flags: <defaults>
</compile_context>

<pallas_src>
import functools
import math

import jax
import jax.numpy as jnp
from jax.experimental import pallas as pl
from jax.experimental.pallas import tpu as pltpu


def snn_kernel(xg_ref,      # (T, BB, 4H) f32   x_t*Wih1^T + b1
               whh1_ref,    # (H, 4H)     bf16  Whh1^T  (gate cols [i,f,o,g])
               wih2_ref,    # (H, 4H)     bf16  Wih2^T
               whh2_ref,    # (H, 4H)     bf16  Whh2^T
               b2_ref,      # (1, 4H)     f32   bih2 + bhh2
               wout_ref,    # ((T+2)H,2P) bf16  Wout^T
               bout_ref,    # (1, 2P)     f32
               out_ref,     # (BB, 2P)    f32
               lst_ref,     # scratch (BB, (T+2)H) f32 : [spk2_0..spk2_T | mem2]
               *, T, H, thr1, thr2):
    B = xg_ref.shape[1]
    f32, bf16 = jnp.float32, jnp.bfloat16

    whh1 = whh1_ref[...]
    wih2 = wih2_ref[...]
    whh2 = whh2_ref[...]
    b2 = jnp.broadcast_to(b2_ref[...], (B, 4 * H))       # hoisted broadcast

    def cell(gates, c):
        # Gate column order is [i, f, o, g] (reordered offline in init_params):
        # one sigmoid over 3H lanes + one tanh over H lanes.
        s = jax.nn.sigmoid(gates[:, :3 * H])
        i_g = s[:, 0 * H:1 * H]
        f_g = s[:, 1 * H:2 * H]
        o_g = s[:, 2 * H:3 * H]
        g_g = jnp.tanh(gates[:, 3 * H:4 * H])
        c_new = f_g * c + i_g * g_g
        h_new = o_g * jnp.tanh(c_new)
        return h_new, c_new

    zeros = jnp.zeros((B, H), f32)

    # cell-1 step 0: h1(-1) = 0, so its recurrent term vanishes exactly.
    h1, c1 = cell(xg_ref[0], zeros)
    spk1 = (h1 > thr1).astype(f32)

    h2, c2 = zeros, zeros
    pre2 = b2                       # h2(-1) @ Whh2^T + b2 with h2(-1) = 0

    # Fully unrolled recurrence: one basic block; the scheduler overlaps
    # cell-1(t+1)'s matmul/EUP work with cell-2(t)'s.
    for t in range(T):
        # cell-2 step t: only the spk1 push is new on this step's chain;
        # pre2 was produced right after h2(t-1) (off-chain).
        gates2 = jnp.dot(spk1.astype(bf16), wih2,
                         preferred_element_type=f32) + pre2
        if t + 1 < T:
            # The only dependent MXU push of the cell-1 chain.
            rec1 = jnp.dot(h1.astype(bf16), whh1,
                           preferred_element_type=f32)
        h2, c2 = cell(gates2, c2)
        # Off-chain: collect spk2(t) into the readout scratch and issue the
        # next step's cell-2 recurrent contribution immediately.
        lst_ref[:, t * H:(t + 1) * H] = (h2 > thr2).astype(f32)
        pre2 = jnp.dot(h2.astype(bf16), whh2,
                       preferred_element_type=f32) + b2
        if t + 1 < T:
            h1, c1 = cell(xg_ref[t + 1] + rec1, c1)
            spk1 = (h1 > thr1).astype(f32)

    # Extra slstm2 step driven by mem1 (= final h1).
    gates2 = jnp.dot(h1.astype(bf16), wih2, preferred_element_type=f32) + pre2
    h2, c2 = cell(gates2, c2)
    lst_ref[:, T * H:(T + 1) * H] = (h2 > thr2).astype(f32)
    lst_ref[:, (T + 1) * H:(T + 2) * H] = h2

    # Fused readout: single (B,(T+2)H) @ ((T+2)H,2P) push + bias.
    out_ref[...] = (jnp.dot(lst_ref[...].astype(bf16), wout_ref[...],
                            preferred_element_type=f32)
                    + jnp.broadcast_to(bout_ref[...], out_ref.shape))


def snn_forward(x, params):
    """x: (B, T, 1) float32  ->  (B, 2*predicted_step) float32."""
    B, T, _ = x.shape
    H = params["whh1"].shape[0]
    P2 = params["bout"].shape[-1]

    # Time-major input; precompute the non-recurrent cell-1 input contribution
    # (x_t * Wih1^T + b1) for all steps outside the kernel.
    x_tm = jnp.transpose(x, (1, 0, 2)).astype(jnp.float32)       # (T, B, 1)
    xg = x_tm * params["wih1"][None] + params["b1"][None]         # (T, B, 4H)

    # Batch tiling: a single "parallel" grid axis shards large batches across
    # TensorCores (v7x) and amortizes fixed overhead; tiny batches = 1 step.
    bb = B if B <= 128 else 128
    assert B % bb == 0, "wrapper expects the batch to divide into blocks"
    grid = (B // bb,)

    kernel = functools.partial(
        snn_kernel, T=T, H=H,
        thr1=float(params["thr1"]), thr2=float(params["thr2"]))

    rep2 = lambda i: (0, 0)          # grid-invariant (broadcast) operands
    return pl.pallas_call(
        kernel,
        out_shape=jax.ShapeDtypeStruct((B, P2), jnp.float32),
        grid=grid,
        in_specs=[
            pl.BlockSpec((T, bb, 4 * H), lambda i: (0, i, 0)),
            pl.BlockSpec((H, 4 * H), rep2),
            pl.BlockSpec((H, 4 * H), rep2),
            pl.BlockSpec((H, 4 * H), rep2),
            pl.BlockSpec((1, 4 * H), rep2),
            pl.BlockSpec(((T + 2) * H, P2), rep2),
            pl.BlockSpec((1, P2), rep2),
        ],
        out_specs=pl.BlockSpec((bb, P2), lambda i: (i, 0)),
        scratch_shapes=[pltpu.VMEM((bb, (T + 2) * H), jnp.float32)],
        compiler_params=pltpu.CompilerParams(
            dimension_semantics=("parallel",)),
    )(xg, params["whh1"], params["wih2"], params["whh2"], params["b2"],
      params["wout"], params["bout"])


def _reorder_ifog(w, H):
    """Reorder the trailing 4H gate axis from PyTorch [i,f,g,o] to [i,f,o,g]."""
    return jnp.concatenate(
        [w[..., 0:2 * H], w[..., 3 * H:4 * H], w[..., 2 * H:3 * H]], axis=-1)


def init_params(key, num_neurons, input_window_size, predicted_step, threshold):
    """Deterministic init mirroring the PyTorch module's parameter shapes."""
    H, T, P = num_neurons, input_window_size, predicted_step
    ks = jax.random.split(key, 9)

    def unif(k, shape, bound):
        return jax.random.uniform(k, shape, jnp.float32, -bound, bound)

    b = 1.0 / math.sqrt(H)
    # slstm1 == nn.LSTMCell(1, H)
    wih1 = unif(ks[0], (4 * H, 1), b)
    whh1 = unif(ks[1], (4 * H, H), b)
    bih1 = unif(ks[2], (4 * H,), b)
    bhh1 = unif(ks[3], (4 * H,), b)
    # slstm2 == nn.LSTMCell(H, H)
    wih2 = unif(ks[4], (4 * H, H), b)
    whh2 = unif(ks[5], (4 * H, H), b)
    bih2 = unif(ks[6], (4 * H,), b)
    bhh2 = unif(ks[7], (4 * H,), b)
    # output Linear((T+2)*H, 2P), bias = tile([0.2, -0.2], P)
    bo = 1.0 / math.sqrt((T + 2) * H)
    wout = unif(ks[8], (2 * P, (T + 2) * H), bo)
    bout = jnp.tile(jnp.asarray([0.2, -0.2], jnp.float32), P)

    bf16 = jnp.bfloat16
    return dict(
        # activations-on-the-left layout, gate columns reordered to [i,f,o,g]
        wih1=_reorder_ifog(wih1.T, H),                        # (1, 4H)   f32
        b1=_reorder_ifog((bih1 + bhh1)[None, :], H),          # (1, 4H)   f32
        whh1=_reorder_ifog(whh1.T, H).astype(bf16),           # (H, 4H)   bf16
        wih2=_reorder_ifog(wih2.T, H).astype(bf16),           # (H, 4H)   bf16
        whh2=_reorder_ifog(whh2.T, H).astype(bf16),           # (H, 4H)   bf16
        b2=_reorder_ifog((bih2 + bhh2)[None, :], H),          # (1, 4H)   f32
        wout=wout.T.astype(bf16),                             # ((T+2)H, 2P)
        bout=bout[None, :],                                   # (1, 2P)   f32
        thr1=float(threshold),
        thr2=float(threshold),
    )


def snn_reference(x, params):
    """Pure-JAX reference mirroring the kernel math and associativity."""
    B, T, _ = x.shape
    H = params["whh1"].shape[0]
    f32, bf16 = jnp.float32, jnp.bfloat16
    thr1, thr2 = params["thr1"], params["thr2"]
    whh1, wih2, whh2 = params["whh1"], params["wih2"], params["whh2"]
    wih1, b1, b2 = params["wih1"], params["b1"], params["b2"]

    def cell(gates, c):
        s = jax.nn.sigmoid(gates[:, :3 * H])
        i_g, f_g, o_g = s[:, :H], s[:, H:2 * H], s[:, 2 * H:3 * H]
        g_g = jnp.tanh(gates[:, 3 * H:])
        c_new = f_g * c + i_g * g_g
        return o_g * jnp.tanh(c_new), c_new

    h1 = c1 = h2 = c2 = jnp.zeros((B, H), f32)
    pre2 = jnp.broadcast_to(b2, (B, 4 * H))
    cols = []
    for t in range(T):
        gates1 = x[:, t, :] * wih1 + b1
        if t > 0:
            gates1 = gates1 + jnp.dot(h1.astype(bf16), whh1,
                                      preferred_element_type=f32)
        h1, c1 = cell(gates1, c1)
        spk1 = (h1 > thr1).astype(f32)
        gates2 = jnp.dot(spk1.astype(bf16), wih2,
                         preferred_element_type=f32) + pre2
        h2, c2 = cell(gates2, c2)
        cols.append((h2 > thr2).astype(f32))
        pre2 = jnp.dot(h2.astype(bf16), whh2,
                       preferred_element_type=f32) + b2
    gates2 = jnp.dot(h1.astype(bf16), wih2, preferred_element_type=f32) + pre2
    h2, c2 = cell(gates2, c2)
    cols.append((h2 > thr2).astype(f32))
    cols.append(h2)
    lst = jnp.concatenate(cols, axis=1)
    return (jnp.dot(lst.astype(bf16), params["wout"],
                    preferred_element_type=f32)
            + params["bout"])


if __name__ == "__main__":
    # Small shapes consistent with the module's forward.
    batch = 2
    num_neurons = 32
    input_window_size = 8
    predicted_step = 1
    threshold = 0.5

    key = jax.random.PRNGKey(0)
    k_x, k_p = jax.random.split(key)
    x = jax.random.normal(k_x, (batch, input_window_size, 1), jnp.float32)
    params = init_params(k_p, num_neurons, input_window_size,
                         predicted_step, threshold)

    out = jax.block_until_ready(snn_forward(x, params))
    ref = jax.block_until_ready(snn_reference(x, params))
    assert out.shape == (batch, 2 * predicted_step)
    assert jnp.allclose(out, ref, atol=1e-3, rtol=1e-3), (out, ref)
    # TODO(synk): learn_threshold / fast_sigmoid surrogate only affect the
    # backward pass; only the forward (hard Heaviside spike) is implemented.
    print("KERNEL_OK")
</pallas_src>

<mosaic_0001>
module attributes {stable_mosaic.version = 11 : i64} {
  func.func @snn_kernel(%arg0: i32, %arg1: memref<8x2x128xf32, #tpu.memory_space<vmem>>, %arg2: memref<32x128xbf16, #tpu.memory_space<vmem>>, %arg3: memref<32x128xbf16, #tpu.memory_space<vmem>>, %arg4: memref<32x128xbf16, #tpu.memory_space<vmem>>, %arg5: memref<1x128xf32, #tpu.memory_space<vmem>>, %arg6: memref<320x2xbf16, #tpu.memory_space<vmem>>, %arg7: memref<1x2xf32, #tpu.memory_space<vmem>>, %arg8: memref<2x2xf32, #tpu.memory_space<vmem>>, %arg9: memref<2x320xf32, #tpu.memory_space<vmem>>) attributes {dimension_semantics = [#tpu.dimension_semantics<parallel>], iteration_bounds = array<i64: 1>, scalar_prefetch = 0 : i64, scratch_operands = 1 : i64, tpu.core_type = #tpu.core_type<tc>, window_params = [{transform_indices = @transform_0, window_bounds = array<i64: 8, 2, 128>}, {pipeline_mode = #tpu.pipeline_mode<synchronous>, transform_indices = @transform_1, window_bounds = array<i64: 32, 128>}, {pipeline_mode = #tpu.pipeline_mode<synchronous>, transform_indices = @transform_2, window_bounds = array<i64: 32, 128>}, {pipeline_mode = #tpu.pipeline_mode<synchronous>, transform_indices = @transform_3, window_bounds = array<i64: 32, 128>}, {pipeline_mode = #tpu.pipeline_mode<synchronous>, transform_indices = @transform_4, window_bounds = array<i64: 1, 128>}, {pipeline_mode = #tpu.pipeline_mode<synchronous>, transform_indices = @transform_5, window_bounds = array<i64: 320, 2>}, {pipeline_mode = #tpu.pipeline_mode<synchronous>, transform_indices = @transform_6, window_bounds = array<i64: 1, 2>}, {transform_indices = @transform_7, window_bounds = array<i64: 2, 2>}]} {
    %c0 = arith.constant 0 : index
    %c0_0 = arith.constant 0 : index
    %0 = vector.load %arg2[%c0, %c0_0] : memref<32x128xbf16, #tpu.memory_space<vmem>>, vector<32x128xbf16>
    %c0_1 = arith.constant 0 : index
    %c0_2 = arith.constant 0 : index
    %1 = vector.load %arg3[%c0_1, %c0_2] : memref<32x128xbf16, #tpu.memory_space<vmem>>, vector<32x128xbf16>
    %c0_3 = arith.constant 0 : index
    %c0_4 = arith.constant 0 : index
    %2 = vector.load %arg4[%c0_3, %c0_4] : memref<32x128xbf16, #tpu.memory_space<vmem>>, vector<32x128xbf16>
    %c0_5 = arith.constant 0 : index
    %c0_6 = arith.constant 0 : index
    %3 = vector.load %arg5[%c0_5, %c0_6] : memref<1x128xf32, #tpu.memory_space<vmem>>, vector<1x128xf32>
    %4 = vector.shape_cast %3 : vector<1x128xf32> to vector<1x128xf32>
    %5 = vector.broadcast %4 : vector<1x128xf32> to vector<2x128xf32>
    %cst = arith.constant 0.000000e+00 : f32
    %6 = vector.broadcast %cst : f32 to vector<2x32xf32>
    %c0_7 = arith.constant 0 : index
    %c0_8 = arith.constant 0 : index
    %c0_9 = arith.constant 0 : index
    %7 = vector.load %arg1[%c0_7, %c0_8, %c0_9] : memref<8x2x128xf32, #tpu.memory_space<vmem>>, vector<1x2x128xf32>
    %8 = vector.shape_cast %7 : vector<1x2x128xf32> to vector<2x128xf32>
    %9 = vector.extract_strided_slice %8 {offsets = [0, 0], sizes = [2, 96], strides = [1, 1]} : vector<2x128xf32> to vector<2x96xf32>
    %10 = arith.negf %9 : vector<2x96xf32>
    %11 = math.exp %10 : vector<2x96xf32>
    %cst_10 = arith.constant 1.000000e+00 : f32
    %12 = vector.broadcast %cst_10 : f32 to vector<2x96xf32>
    %13 = arith.addf %12, %11 : vector<2x96xf32>
    %14 = arith.divf %12, %13 : vector<2x96xf32>
    %15 = vector.extract_strided_slice %14 {offsets = [0, 0], sizes = [2, 32], strides = [1, 1]} : vector<2x96xf32> to vector<2x32xf32>
    %16 = vector.extract_strided_slice %14 {offsets = [0, 32], sizes = [2, 32], strides = [1, 1]} : vector<2x96xf32> to vector<2x32xf32>
    %17 = vector.extract_strided_slice %14 {offsets = [0, 64], sizes = [2, 32], strides = [1, 1]} : vector<2x96xf32> to vector<2x32xf32>
    %18 = vector.extract_strided_slice %8 {offsets = [0, 96], sizes = [2, 32], strides = [1, 1]} : vector<2x128xf32> to vector<2x32xf32>
    %19 = math.tanh %18 : vector<2x32xf32>
    %20 = arith.mulf %16, %6 : vector<2x32xf32>
    %21 = arith.mulf %15, %19 : vector<2x32xf32>
    %22 = arith.addf %20, %21 : vector<2x32xf32>
    %23 = math.tanh %22 : vector<2x32xf32>
    %24 = arith.mulf %17, %23 : vector<2x32xf32>
    %cst_11 = arith.constant 5.000000e-01 : f32
    %25 = vector.broadcast %cst_11 : f32 to vector<2x32xf32>
    %26 = arith.cmpf ogt, %24, %25 : vector<2x32xf32>
    %27 = arith.extui %26 : vector<2x32xi1> to vector<2x32xi32>
    %28 = arith.sitofp %27 : vector<2x32xi32> to vector<2x32xf32>
    %29 = arith.truncf %28 : vector<2x32xf32> to vector<2x32xbf16>
    %cst_12 = arith.constant dense<0.000000e+00> : vector<2x128xf32>
    %30 = tpu.matmul %29, %1, %cst_12 {dimension_numbers = #tpu.dot_dimension_numbers<[1], [0], [0], [1], [0, 0, 1, 1], [], []>} : vector<2x32xbf16>, vector<32x128xbf16>, vector<2x128xf32> -> vector<2x128xf32>
    %31 = arith.addf %30, %5 : vector<2x128xf32>
    %32 = arith.truncf %24 : vector<2x32xf32> to vector<2x32xbf16>
    %cst_13 = arith.constant dense<0.000000e+00> : vector<2x128xf32>
    %33 = tpu.matmul %32, %0, %cst_13 {dimension_numbers = #tpu.dot_dimension_numbers<[1], [0], [0], [1], [0, 0, 1, 1], [], []>} : vector<2x32xbf16>, vector<32x128xbf16>, vector<2x128xf32> -> vector<2x128xf32>
    %34 = vector.extract_strided_slice %31 {offsets = [0, 0], sizes = [2, 96], strides = [1, 1]} : vector<2x128xf32> to vector<2x96xf32>
    %35 = arith.negf %34 : vector<2x96xf32>
    %36 = math.exp %35 : vector<2x96xf32>
    %cst_14 = arith.constant 1.000000e+00 : f32
    %37 = vector.broadcast %cst_14 : f32 to vector<2x96xf32>
    %38 = arith.addf %37, %36 : vector<2x96xf32>
    %39 = arith.divf %37, %38 : vector<2x96xf32>
    %40 = vector.extract_strided_slice %39 {offsets = [0, 0], sizes = [2, 32], strides = [1, 1]} : vector<2x96xf32> to vector<2x32xf32>
    %41 = vector.extract_strided_slice %39 {offsets = [0, 32], sizes = [2, 32], strides = [1, 1]} : vector<2x96xf32> to vector<2x32xf32>
    %42 = vector.extract_strided_slice %39 {offsets = [0, 64], sizes = [2, 32], strides = [1, 1]} : vector<2x96xf32> to vector<2x32xf32>
    %43 = vector.extract_strided_slice %31 {offsets = [0, 96], sizes = [2, 32], strides = [1, 1]} : vector<2x128xf32> to vector<2x32xf32>
    %44 = math.tanh %43 : vector<2x32xf32>
    %45 = arith.mulf %41, %6 : vector<2x32xf32>
    %46 = arith.mulf %40, %44 : vector<2x32xf32>
    %47 = arith.addf %45, %46 : vector<2x32xf32>
    %48 = math.tanh %47 : vector<2x32xf32>
    %49 = arith.mulf %42, %48 : vector<2x32xf32>
    %cst_15 = arith.constant 5.000000e-01 : f32
    %50 = vector.broadcast %cst_15 : f32 to vector<2x32xf32>
    %51 = arith.cmpf ogt, %49, %50 : vector<2x32xf32>
    %52 = arith.extui %51 : vector<2x32xi1> to vector<2x32xi32>
    %53 = arith.sitofp %52 : vector<2x32xi32> to vector<2x32xf32>
    %c0_16 = arith.constant 0 : index
    %c0_17 = arith.constant 0 : index
    %54 = vector.load %arg9[%c0_16, %c0_17] : memref<2x320xf32, #tpu.memory_space<vmem>>, vector<2x32xf32>
    tpu.vector_store %arg9[%c0_16, %c0_17], %53 {strides = array<i32>} : memref<2x320xf32, #tpu.memory_space<vmem>>, vector<2x32xf32>,
    %55 = arith.truncf %49 : vector<2x32xf32> to vector<2x32xbf16>
    %cst_18 = arith.constant dense<0.000000e+00> : vector<2x128xf32>
    %56 = tpu.matmul %55, %2, %cst_18 {dimension_numbers = #tpu.dot_dimension_numbers<[1], [0], [0], [1], [0, 0, 1, 1], [], []>} : vector<2x32xbf16>, vector<32x128xbf16>, vector<2x128xf32> -> vector<2x128xf32>
    %57 = arith.addf %56, %5 : vector<2x128xf32>
    %c1 = arith.constant 1 : index
    %c0_19 = arith.constant 0 : index
    %c0_20 = arith.constant 0 : index
    %58 = vector.load %arg1[%c1, %c0_19, %c0_20] : memref<8x2x128xf32, #tpu.memory_space<vmem>>, vector<1x2x128xf32>
    %59 = vector.shape_cast %58 : vector<1x2x128xf32> to vector<2x128xf32>
    %60 = arith.addf %59, %33 : vector<2x128xf32>
    %61 = vector.extract_strided_slice %60 {offsets = [0, 0], sizes = [2, 96], strides = [1, 1]} : vector<2x128xf32> to vector<2x96xf32>
    %62 = arith.negf %61 : vector<2x96xf32>
    %63 = math.exp %62 : vector<2x96xf32>
    %cst_21 = arith.constant 1.000000e+00 : f32
    %64 = vector.broadcast %cst_21 : f32 to vector<2x96xf32>
    %65 = arith.addf %64, %63 : vector<2x96xf32>
    %66 = arith.divf %64, %65 : vector<2x96xf32>
    %67 = vector.extract_strided_slice %66 {offsets = [0, 0], sizes = [2, 32], strides = [1, 1]} : vector<2x96xf32> to vector<2x32xf32>
    %68 = vector.extract_strided_slice %66 {offsets = [0, 32], sizes = [2, 32], strides = [1, 1]} : vector<2x96xf32> to vector<2x32xf32>
    %69 = vector.extract_strided_slice %66 {offsets = [0, 64], sizes = [2, 32], strides = [1, 1]} : vector<2x96xf32> to vector<2x32xf32>
    %70 = vector.extract_strided_slice %60 {offsets = [0, 96], sizes = [2, 32], strides = [1, 1]} : vector<2x128xf32> to vector<2x32xf32>
    %71 = math.tanh %70 : vector<2x32xf32>
    %72 = arith.mulf %68, %22 : vector<2x32xf32>
    %73 = arith.mulf %67, %71 : vector<2x32xf32>
    %74 = arith.addf %72, %73 : vector<2x32xf32>
    %75 = math.tanh %74 : vector<2x32xf32>
    %76 = arith.mulf %69, %75 : vector<2x32xf32>
    %cst_22 = arith.constant 5.000000e-01 : f32
    %77 = vector.broadcast %cst_22 : f32 to vector<2x32xf32>
    %78 = arith.cmpf ogt, %76, %77 : vector<2x32xf32>
    %79 = arith.extui %78 : vector<2x32xi1> to vector<2x32xi32>
    %80 = arith.sitofp %79 : vector<2x32xi32> to vector<2x32xf32>
    %81 = arith.truncf %80 : vector<2x32xf32> to vector<2x32xbf16>
    %cst_23 = arith.constant dense<0.000000e+00> : vector<2x128xf32>
    %82 = tpu.matmul %81, %1, %cst_23 {dimension_numbers = #tpu.dot_dimension_numbers<[1], [0], [0], [1], [0, 0, 1, 1], [], []>} : vector<2x32xbf16>, vector<32x128xbf16>, vector<2x128xf32> -> vector<2x128xf32>
    %83 = arith.addf %82, %57 : vector<2x128xf32>
    %84 = arith.truncf %76 : vector<2x32xf32> to vector<2x32xbf16>
    %cst_24 = arith.constant dense<0.000000e+00> : vector<2x128xf32>
    %85 = tpu.matmul %84, %0, %cst_24 {dimension_numbers = #tpu.dot_dimension_numbers<[1], [0], [0], [1], [0, 0, 1, 1], [], []>} : vector<2x32xbf16>, vector<32x128xbf16>, vector<2x128xf32> -> vector<2x128xf32>
    %86 = vector.extract_strided_slice %83 {offsets = [0, 0], sizes = [2, 96], strides = [1, 1]} : vector<2x128xf32> to vector<2x96xf32>
    %87 = arith.negf %86 : vector<2x96xf32>
    %88 = math.exp %87 : vector<2x96xf32>
    %cst_25 = arith.constant 1.000000e+00 : f32
    %89 = vector.broadcast %cst_25 : f32 to vector<2x96xf32>
    %90 = arith.addf %89, %88 : vector<2x96xf32>
    %91 = arith.divf %89, %90 : vector<2x96xf32>
    %92 = vector.extract_strided_slice %91 {offsets = [0, 0], sizes = [2, 32], strides = [1, 1]} : vector<2x96xf32> to vector<2x32xf32>
    %93 = vector.extract_strided_slice %91 {offsets = [0, 32], sizes = [2, 32], strides = [1, 1]} : vector<2x96xf32> to vector<2x32xf32>
    %94 = vector.extract_strided_slice %91 {offsets = [0, 64], sizes = [2, 32], strides = [1, 1]} : vector<2x96xf32> to vector<2x32xf32>
    %95 = vector.extract_strided_slice %83 {offsets = [0, 96], sizes = [2, 32], strides = [1, 1]} : vector<2x128xf32> to vector<2x32xf32>
    %96 = math.tanh %95 : vector<2x32xf32>
    %97 = arith.mulf %93, %47 : vector<2x32xf32>
    %98 = arith.mulf %92, %96 : vector<2x32xf32>
    %99 = arith.addf %97, %98 : vector<2x32xf32>
    %100 = math.tanh %99 : vector<2x32xf32>
    %101 = arith.mulf %94, %100 : vector<2x32xf32>
    %cst_26 = arith.constant 5.000000e-01 : f32
    %102 = vector.broadcast %cst_26 : f32 to vector<2x32xf32>
    %103 = arith.cmpf ogt, %101, %102 : vector<2x32xf32>
    %104 = arith.extui %103 : vector<2x32xi1> to vector<2x32xi32>
    %105 = arith.sitofp %104 : vector<2x32xi32> to vector<2x32xf32>
    %c0_27 = arith.constant 0 : index
    %c32 = arith.constant 32 : index
    %106 = vector.load %arg9[%c0_27, %c32] : memref<2x320xf32, #tpu.memory_space<vmem>>, vector<2x32xf32>
    tpu.vector_store %arg9[%c0_27, %c32], %105 {strides = array<i32>} : memref<2x320xf32, #tpu.memory_space<vmem>>, vector<2x32xf32>,
    %107 = arith.truncf %101 : vector<2x32xf32> to vector<2x32xbf16>
    %cst_28 = arith.constant dense<0.000000e+00> : vector<2x128xf32>
    %108 = tpu.matmul %107, %2, %cst_28 {dimension_numbers = #tpu.dot_dimension_numbers<[1], [0], [0], [1], [0, 0, 1, 1], [], []>} : vector<2x32xbf16>, vector<32x128xbf16>, vector<2x128xf32> -> vector<2x128xf32>
    %109 = arith.addf %108, %5 : vector<2x128xf32>
    %c2 = arith.constant 2 : index
    %c0_29 = arith.constant 0 : index
    %c0_30 = arith.constant 0 : index
    %110 = vector.load %arg1[%c2, %c0_29, %c0_30] : memref<8x2x128xf32, #tpu.memory_space<vmem>>, vector<1x2x128xf32>
    %111 = vector.shape_cast %110 : vector<1x2x128xf32> to vector<2x128xf32>
    %112 = arith.addf %111, %85 : vector<2x128xf32>
    %113 = vector.extract_strided_slice %112 {offsets = [0, 0], sizes = [2, 96], strides = [1, 1]} : vector<2x128xf32> to vector<2x96xf32>
    %114 = arith.negf %113 : vector<2x96xf32>
    %115 = math.exp %114 : vector<2x96xf32>
    %cst_31 = arith.constant 1.000000e+00 : f32
    %116 = vector.broadcast %cst_31 : f32 to vector<2x96xf32>
    %117 = arith.addf %116, %115 : vector<2x96xf32>
    %118 = arith.divf %116, %117 : vector<2x96xf32>
    %119 = vector.extract_strided_slice %118 {offsets = [0, 0], sizes = [2, 32], strides = [1, 1]} : vector<2x96xf32> to vector<2x32xf32>
    %120 = vector.extract_strided_slice %118 {offsets = [0, 32], sizes = [2, 32], strides = [1, 1]} : vector<2x96xf32> to vector<2x32xf32>
    %121 = vector.extract_strided_slice %118 {offsets = [0, 64], sizes = [2, 32], strides = [1, 1]} : vector<2x96xf32> to vector<2x32xf32>
    %122 = vector.extract_strided_slice %112 {offsets = [0, 96], sizes = [2, 32], strides = [1, 1]} : vector<2x128xf32> to vector<2x32xf32>
    %123 = math.tanh %122 : vector<2x32xf32>
    %124 = arith.mulf %120, %74 : vector<2x32xf32>
    %125 = arith.mulf %119, %123 : vector<2x32xf32>
    %126 = arith.addf %124, %125 : vector<2x32xf32>
    %127 = math.tanh %126 : vector<2x32xf32>
    %128 = arith.mulf %121, %127 : vector<2x32xf32>
    %cst_32 = arith.constant 5.000000e-01 : f32
    %129 = vector.broadcast %cst_32 : f32 to vector<2x32xf32>
    %130 = arith.cmpf ogt, %128, %129 : vector<2x32xf32>
    %131 = arith.extui %130 : vector<2x32xi1> to vector<2x32xi32>
    %132 = arith.sitofp %131 : vector<2x32xi32> to vector<2x32xf32>
    %133 = arith.truncf %132 : vector<2x32xf32> to vector<2x32xbf16>
    %cst_33 = arith.constant dense<0.000000e+00> : vector<2x128xf32>
    %134 = tpu.matmul %133, %1, %cst_33 {dimension_numbers = #tpu.dot_dimension_numbers<[1], [0], [0], [1], [0, 0, 1, 1], [], []>} : vector<2x32xbf16>, vector<32x128xbf16>, vector<2x128xf32> -> vector<2x128xf32>
    %135 = arith.addf %134, %109 : vector<2x128xf32>
    %136 = arith.truncf %128 : vector<2x32xf32> to vector<2x32xbf16>
    %cst_34 = arith.constant dense<0.000000e+00> : vector<2x128xf32>
    %137 = tpu.matmul %136, %0, %cst_34 {dimension_numbers = #tpu.dot_dimension_numbers<[1], [0], [0], [1], [0, 0, 1, 1], [], []>} : vector<2x32xbf16>, vector<32x128xbf16>, vector<2x128xf32> -> vector<2x128xf32>
    %138 = vector.extract_strided_slice %135 {offsets = [0, 0], sizes = [2, 96], strides = [1, 1]} : vector<2x128xf32> to vector<2x96xf32>
    %139 = arith.negf %138 : vector<2x96xf32>
    %140 = math.exp %139 : vector<2x96xf32>
    %cst_35 = arith.constant 1.000000e+00 : f32
    %141 = vector.broadcast %cst_35 : f32 to vector<2x96xf32>
    %142 = arith.addf %141, %140 : vector<2x96xf32>
    %143 = arith.divf %141, %142 : vector<2x96xf32>
    %144 = vector.extract_strided_slice %143 {offsets = [0, 0], sizes = [2, 32], strides = [1, 1]} : vector<2x96xf32> to vector<2x32xf32>
    %145 = vector.extract_strided_slice %143 {offsets = [0, 32], sizes = [2, 32], strides = [1, 1]} : vector<2x96xf32> to vector<2x32xf32>
    %146 = vector.extract_strided_slice %143 {offsets = [0, 64], sizes = [2, 32], strides = [1, 1]} : vector<2x96xf32> to vector<2x32xf32>
    %147 = vector.extract_strided_slice %135 {offsets = [0, 96], sizes = [2, 32], strides = [1, 1]} : vector<2x128xf32> to vector<2x32xf32>
    %148 = math.tanh %147 : vector<2x32xf32>
    %149 = arith.mulf %145, %99 : vector<2x32xf32>
    %150 = arith.mulf %144, %148 : vector<2x32xf32>
    %151 = arith.addf %149, %150 : vector<2x32xf32>
    %152 = math.tanh %151 : vector<2x32xf32>
    %153 = arith.mulf %146, %152 : vector<2x32xf32>
    %cst_36 = arith.constant 5.000000e-01 : f32
    %154 = vector.broadcast %cst_36 : f32 to vector<2x32xf32>
    %155 = arith.cmpf ogt, %153, %154 : vector<2x32xf32>
    %156 = arith.extui %155 : vector<2x32xi1> to vector<2x32xi32>
    %157 = arith.sitofp %156 : vector<2x32xi32> to vector<2x32xf32>
    %c0_37 = arith.constant 0 : index
    %c64 = arith.constant 64 : index
    %158 = vector.load %arg9[%c0_37, %c64] : memref<2x320xf32, #tpu.memory_space<vmem>>, vector<2x32xf32>
    tpu.vector_store %arg9[%c0_37, %c64], %157 {strides = array<i32>} : memref<2x320xf32, #tpu.memory_space<vmem>>, vector<2x32xf32>,
    %159 = arith.truncf %153 : vector<2x32xf32> to vector<2x32xbf16>
    %cst_38 = arith.constant dense<0.000000e+00> : vector<2x128xf32>
    %160 = tpu.matmul %159, %2, %cst_38 {dimension_numbers = #tpu.dot_dimension_numbers<[1], [0], [0], [1], [0, 0, 1, 1], [], []>} : vector<2x32xbf16>, vector<32x128xbf16>, vector<2x128xf32> -> vector<2x128xf32>
    %161 = arith.addf %160, %5 : vector<2x128xf32>
    %c3 = arith.constant 3 : index
    %c0_39 = arith.constant 0 : index
    %c0_40 = arith.constant 0 : index
    %162 = vector.load %arg1[%c3, %c0_39, %c0_40] : memref<8x2x128xf32, #tpu.memory_space<vmem>>, vector<1x2x128xf32>
    %163 = vector.shape_cast %162 : vector<1x2x128xf32> to vector<2x128xf32>
    %164 = arith.addf %163, %137 : vector<2x128xf32>
    %165 = vector.extract_strided_slice %164 {offsets = [0, 0], sizes = [2, 96], strides = [1, 1]} : vector<2x128xf32> to vector<2x96xf32>
    %166 = arith.negf %165 : vector<2x96xf32>
    %167 = math.exp %166 : vector<2x96xf32>
    %cst_41 = arith.constant 1.000000e+00 : f32
    %168 = vector.broadcast %cst_41 : f32 to vector<2x96xf32>
    %169 = arith.addf %168, %167 : vector<2x96xf32>
    %170 = arith.divf %168, %169 : vector<2x96xf32>
    %171 = vector.extract_strided_slice %170 {offsets = [0, 0], sizes = [2, 32], strides = [1, 1]} : vector<2x96xf32> to vector<2x32xf32>
    %172 = vector.extract_strided_slice %170 {offsets = [0, 32], sizes = [2, 32], strides = [1, 1]} : vector<2x96xf32> to vector<2x32xf32>
    %173 = vector.extract_strided_slice %170 {offsets = [0, 64], sizes = [2, 32], strides = [1, 1]} : vector<2x96xf32> to vector<2x32xf32>
    %174 = vector.extract_strided_slice %164 {offsets = [0, 96], sizes = [2, 32], strides = [1, 1]} : vector<2x128xf32> to vector<2x32xf32>
    %175 = math.tanh %174 : vector<2x32xf32>
    %176 = arith.mulf %172, %126 : vector<2x32xf32>
    %177 = arith.mulf %171, %175 : vector<2x32xf32>
    %178 = arith.addf %176, %177 : vector<2x32xf32>
    %179 = math.tanh %178 : vector<2x32xf32>
    %180 = arith.mulf %173, %179 : vector<2x32xf32>
    %cst_42 = arith.constant 5.000000e-01 : f32
    %181 = vector.broadcast %cst_42 : f32 to vector<2x32xf32>
    %182 = arith.cmpf ogt, %180, %181 : vector<2x32xf32>
    %183 = arith.extui %182 : vector<2x32xi1> to vector<2x32xi32>
    %184 = arith.sitofp %183 : vector<2x32xi32> to vector<2x32xf32>
    %185 = arith.truncf %184 : vector<2x32xf32> to vector<2x32xbf16>
    %cst_43 = arith.constant dense<0.000000e+00> : vector<2x128xf32>
    %186 = tpu.matmul %185, %1, %cst_43 {dimension_numbers = #tpu.dot_dimension_numbers<[1], [0], [0], [1], [0, 0, 1, 1], [], []>} : vector<2x32xbf16>, vector<32x128xbf16>, vector<2x128xf32> -> vector<2x128xf32>
    %187 = arith.addf %186, %161 : vector<2x128xf32>
    %188 = arith.truncf %180 : vector<2x32xf32> to vector<2x32xbf16>
    %cst_44 = arith.constant dense<0.000000e+00> : vector<2x128xf32>
    %189 = tpu.matmul %188, %0, %cst_44 {dimension_numbers = #tpu.dot_dimension_numbers<[1], [0], [0], [1], [0, 0, 1, 1], [], []>} : vector<2x32xbf16>, vector<32x128xbf16>, vector<2x128xf32> -> vector<2x128xf32>
    %190 = vector.extract_strided_slice %187 {offsets = [0, 0], sizes = [2, 96], strides = [1, 1]} : vector<2x128xf32> to vector<2x96xf32>
    %191 = arith.negf %190 : vector<2x96xf32>
    %192 = math.exp %191 : vector<2x96xf32>
    %cst_45 = arith.constant 1.000000e+00 : f32
    %193 = vector.broadcast %cst_45 : f32 to vector<2x96xf32>
    %194 = arith.addf %193, %192 : vector<2x96xf32>
    %195 = arith.divf %193, %194 : vector<2x96xf32>
    %196 = vector.extract_strided_slice %195 {offsets = [0, 0], sizes = [2, 32], strides = [1, 1]} : vector<2x96xf32> to vector<2x32xf32>
    %197 = vector.extract_strided_slice %195 {offsets = [0, 32], sizes = [2, 32], strides = [1, 1]} : vector<2x96xf32> to vector<2x32xf32>
    %198 = vector.extract_strided_slice %195 {offsets = [0, 64], sizes = [2, 32], strides = [1, 1]} : vector<2x96xf32> to vector<2x32xf32>
    %199 = vector.extract_strided_slice %187 {offsets = [0, 96], sizes = [2, 32], strides = [1, 1]} : vector<2x128xf32> to vector<2x32xf32>
    %200 = math.tanh %199 : vector<2x32xf32>
    %201 = arith.mulf %197, %151 : vector<2x32xf32>
    %202 = arith.mulf %196, %200 : vector<2x32xf32>
    %203 = arith.addf %201, %202 : vector<2x32xf32>
    %204 = math.tanh %203 : vector<2x32xf32>
    %205 = arith.mulf %198, %204 : vector<2x32xf32>
    %cst_46 = arith.constant 5.000000e-01 : f32
    %206 = vector.broadcast %cst_46 : f32 to vector<2x32xf32>
    %207 = arith.cmpf ogt, %205, %206 : vector<2x32xf32>
    %208 = arith.extui %207 : vector<2x32xi1> to vector<2x32xi32>
    %209 = arith.sitofp %208 : vector<2x32xi32> to vector<2x32xf32>
    %c0_47 = arith.constant 0 : index
    %c96 = arith.constant 96 : index
    %210 = vector.load %arg9[%c0_47, %c96] : memref<2x320xf32, #tpu.memory_space<vmem>>, vector<2x32xf32>
    tpu.vector_store %arg9[%c0_47, %c96], %209 {strides = array<i32>} : memref<2x320xf32, #tpu.memory_space<vmem>>, vector<2x32xf32>,
    %211 = arith.truncf %205 : vector<2x32xf32> to vector<2x32xbf16>
    %cst_48 = arith.constant dense<0.000000e+00> : vector<2x128xf32>
    %212 = tpu.matmul %211, %2, %cst_48 {dimension_numbers = #tpu.dot_dimension_numbers<[1], [0], [0], [1], [0, 0, 1, 1], [], []>} : vector<2x32xbf16>, vector<32x128xbf16>, vector<2x128xf32> -> vector<2x128xf32>
    %213 = arith.addf %212, %5 : vector<2x128xf32>
    %c4 = arith.constant 4 : index
    %c0_49 = arith.constant 0 : index
    %c0_50 = arith.constant 0 : index
    %214 = vector.load %arg1[%c4, %c0_49, %c0_50] : memref<8x2x128xf32, #tpu.memory_space<vmem>>, vector<1x2x128xf32>
    %215 = vector.shape_cast %214 : vector<1x2x128xf32> to vector<2x128xf32>
    %216 = arith.addf %215, %189 : vector<2x128xf32>
    %217 = vector.extract_strided_slice %216 {offsets = [0, 0], sizes = [2, 96], strides = [1, 1]} : vector<2x128xf32> to vector<2x96xf32>
    %218 = arith.negf %217 : vector<2x96xf32>
    %219 = math.exp %218 : vector<2x96xf32>
    %cst_51 = arith.constant 1.000000e+00 : f32
    %220 = vector.broadcast %cst_51 : f32 to vector<2x96xf32>
    %221 = arith.addf %220, %219 : vector<2x96xf32>
    %222 = arith.divf %220, %221 : vector<2x96xf32>
    %223 = vector.extract_strided_slice %222 {offsets = [0, 0], sizes = [2, 32], strides = [1, 1]} : vector<2x96xf32> to vector<2x32xf32>
    %224 = vector.extract_strided_slice %222 {offsets = [0, 32], sizes = [2, 32], strides = [1, 1]} : vector<2x96xf32> to vector<2x32xf32>
    %225 = vector.extract_strided_slice %222 {offsets = [0, 64], sizes = [2, 32], strides = [1, 1]} : vector<2x96xf32> to vector<2x32xf32>
    %226 = vector.extract_strided_slice %216 {offsets = [0, 96], sizes = [2, 32], strides = [1, 1]} : vector<2x128xf32> to vector<2x32xf32>
    %227 = math.tanh %226 : vector<2x32xf32>
    %228 = arith.mulf %224, %178 : vector<2x32xf32>
    %229 = arith.mulf %223, %227 : vector<2x32xf32>
    %230 = arith.addf %228, %229 : vector<2x32xf32>
    %231 = math.tanh %230 : vector<2x32xf32>
    %232 = arith.mulf %225, %231 : vector<2x32xf32>
    %cst_52 = arith.constant 5.000000e-01 : f32
    %233 = vector.broadcast %cst_52 : f32 to vector<2x32xf32>
    %234 = arith.cmpf ogt, %232, %233 : vector<2x32xf32>
    %235 = arith.extui %234 : vector<2x32xi1> to vector<2x32xi32>
    %236 = arith.sitofp %235 : vector<2x32xi32> to vector<2x32xf32>
    %237 = arith.truncf %236 : vector<2x32xf32> to vector<2x32xbf16>
    %cst_53 = arith.constant dense<0.000000e+00> : vector<2x128xf32>
    %238 = tpu.matmul %237, %1, %cst_53 {dimension_numbers = #tpu.dot_dimension_numbers<[1], [0], [0], [1], [0, 0, 1, 1], [], []>} : vector<2x32xbf16>, vector<32x128xbf16>, vector<2x128xf32> -> vector<2x128xf32>
    %239 = arith.addf %238, %213 : vector<2x128xf32>
    %240 = arith.truncf %232 : vector<2x32xf32> to vector<2x32xbf16>
    %cst_54 = arith.constant dense<0.000000e+00> : vector<2x128xf32>
    %241 = tpu.matmul %240, %0, %cst_54 {dimension_numbers = #tpu.dot_dimension_numbers<[1], [0], [0], [1], [0, 0, 1, 1], [], []>} : vector<2x32xbf16>, vector<32x128xbf16>, vector<2x128xf32> -> vector<2x128xf32>
    %242 = vector.extract_strided_slice %239 {offsets = [0, 0], sizes = [2, 96], strides = [1, 1]} : vector<2x128xf32> to vector<2x96xf32>
    %243 = arith.negf %242 : vector<2x96xf32>
    %244 = math.exp %243 : vector<2x96xf32>
    %cst_55 = arith.constant 1.000000e+00 : f32
    %245 = vector.broadcast %cst_55 : f32 to vector<2x96xf32>
    %246 = arith.addf %245, %244 : vector<2x96xf32>
    %247 = arith.divf %245, %246 : vector<2x96xf32>
    %248 = vector.extract_strided_slice %247 {offsets = [0, 0], sizes = [2, 32], strides = [1, 1]} : vector<2x96xf32> to vector<2x32xf32>
    %249 = vector.extract_strided_slice %247 {offsets = [0, 32], sizes = [2, 32], strides = [1, 1]} : vector<2x96xf32> to vector<2x32xf32>
    %250 = vector.extract_strided_slice %247 {offsets = [0, 64], sizes = [2, 32], strides = [1, 1]} : vector<2x96xf32> to vector<2x32xf32>
    %251 = vector.extract_strided_slice %239 {offsets = [0, 96], sizes = [2, 32], strides = [1, 1]} : vector<2x128xf32> to vector<2x32xf32>
    %252 = math.tanh %251 : vector<2x32xf32>
    %253 = arith.mulf %249, %203 : vector<2x32xf32>
    %254 = arith.mulf %248, %252 : vector<2x32xf32>
    %255 = arith.addf %253, %254 : vector<2x32xf32>
    %256 = math.tanh %255 : vector<2x32xf32>
    %257 = arith.mulf %250, %256 : vector<2x32xf32>
    %cst_56 = arith.constant 5.000000e-01 : f32
    %258 = vector.broadcast %cst_56 : f32 to vector<2x32xf32>
    %259 = arith.cmpf ogt, %257, %258 : vector<2x32xf32>
    %260 = arith.extui %259 : vector<2x32xi1> to vector<2x32xi32>
    %261 = arith.sitofp %260 : vector<2x32xi32> to vector<2x32xf32>
    %c0_57 = arith.constant 0 : index
    %c128 = arith.constant 128 : index
    %262 = vector.load %arg9[%c0_57, %c128] : memref<2x320xf32, #tpu.memory_space<vmem>>, vector<2x32xf32>
    tpu.vector_store %arg9[%c0_57, %c128], %261 {strides = array<i32>} : memref<2x320xf32, #tpu.memory_space<vmem>>, vector<2x32xf32>,
    %263 = arith.truncf %257 : vector<2x32xf32> to vector<2x32xbf16>
    %cst_58 = arith.constant dense<0.000000e+00> : vector<2x128xf32>
    %264 = tpu.matmul %263, %2, %cst_58 {dimension_numbers = #tpu.dot_dimension_numbers<[1], [0], [0], [1], [0, 0, 1, 1], [], []>} : vector<2x32xbf16>, vector<32x128xbf16>, vector<2x128xf32> -> vector<2x128xf32>
    %265 = arith.addf %264, %5 : vector<2x128xf32>
    %c5 = arith.constant 5 : index
    %c0_59 = arith.constant 0 : index
    %c0_60 = arith.constant 0 : index
    %266 = vector.load %arg1[%c5, %c0_59, %c0_60] : memref<8x2x128xf32, #tpu.memory_space<vmem>>, vector<1x2x128xf32>
    %267 = vector.shape_cast %266 : vector<1x2x128xf32> to vector<2x128xf32>
    %268 = arith.addf %267, %241 : vector<2x128xf32>
    %269 = vector.extract_strided_slice %268 {offsets = [0, 0], sizes = [2, 96], strides = [1, 1]} : vector<2x128xf32> to vector<2x96xf32>
    %270 = arith.negf %269 : vector<2x96xf32>
    %271 = math.exp %270 : vector<2x96xf32>
    %cst_61 = arith.constant 1.000000e+00 : f32
    %272 = vector.broadcast %cst_61 : f32 to vector<2x96xf32>
    %273 = arith.addf %272, %271 : vector<2x96xf32>
    %274 = arith.divf %272, %273 : vector<2x96xf32>
    %275 = vector.extract_strided_slice %274 {offsets = [0, 0], sizes = [2, 32], strides = [1, 1]} : vector<2x96xf32> to vector<2x32xf32>
    %276 = vector.extract_strided_slice %274 {offsets = [0, 32], sizes = [2, 32], strides = [1, 1]} : vector<2x96xf32> to vector<2x32xf32>
    %277 = vector.extract_strided_slice %274 {offsets = [0, 64], sizes = [2, 32], strides = [1, 1]} : vector<2x96xf32> to vector<2x32xf32>
    %278 = vector.extract_strided_slice %268 {offsets = [0, 96], sizes = [2, 32], strides = [1, 1]} : vector<2x128xf32> to vector<2x32xf32>
    %279 = math.tanh %278 : vector<2x32xf32>
    %280 = arith.mulf %276, %230 : vector<2x32xf32>
    %281 = arith.mulf %275, %279 : vector<2x32xf32>
    %282 = arith.addf %280, %281 : vector<2x32xf32>
    %283 = math.tanh %282 : vector<2x32xf32>
    %284 = arith.mulf %277, %283 : vector<2x32xf32>
    %cst_62 = arith.constant 5.000000e-01 : f32
    %285 = vector.broadcast %cst_62 : f32 to vector<2x32xf32>
    %286 = arith.cmpf ogt, %284, %285 : vector<2x32xf32>
    %287 = arith.extui %286 : vector<2x32xi1> to vector<2x32xi32>
    %288 = arith.sitofp %287 : vector<2x32xi32> to vector<2x32xf32>
    %289 = arith.truncf %288 : vector<2x32xf32> to vector<2x32xbf16>
    %cst_63 = arith.constant dense<0.000000e+00> : vector<2x128xf32>
    %290 = tpu.matmul %289, %1, %cst_63 {dimension_numbers = #tpu.dot_dimension_numbers<[1], [0], [0], [1], [0, 0, 1, 1], [], []>} : vector<2x32xbf16>, vector<32x128xbf16>, vector<2x128xf32> -> vector<2x128xf32>
    %291 = arith.addf %290, %265 : vector<2x128xf32>
    %292 = arith.truncf %284 : vector<2x32xf32> to vector<2x32xbf16>
    %cst_64 = arith.constant dense<0.000000e+00> : vector<2x128xf32>
    %293 = tpu.matmul %292, %0, %cst_64 {dimension_numbers = #tpu.dot_dimension_numbers<[1], [0], [0], [1], [0, 0, 1, 1], [], []>} : vector<2x32xbf16>, vector<32x128xbf16>, vector<2x128xf32> -> vector<2x128xf32>
    %294 = vector.extract_strided_slice %291 {offsets = [0, 0], sizes = [2, 96], strides = [1, 1]} : vector<2x128xf32> to vector<2x96xf32>
    %295 = arith.negf %294 : vector<2x96xf32>
    %296 = math.exp %295 : vector<2x96xf32>
    %cst_65 = arith.constant 1.000000e+00 : f32
    %297 = vector.broadcast %cst_65 : f32 to vector<2x96xf32>
    %298 = arith.addf %297, %296 : vector<2x96xf32>
    %299 = arith.divf %297, %298 : vector<2x96xf32>
    %300 = vector.extract_strided_slice %299 {offsets = [0, 0], sizes = [2, 32], strides = [1, 1]} : vector<2x96xf32> to vector<2x32xf32>
    %301 = vector.extract_strided_slice %299 {offsets = [0, 32], sizes = [2, 32], strides = [1, 1]} : vector<2x96xf32> to vector<2x32xf32>
    %302 = vector.extract_strided_slice %299 {offsets = [0, 64], sizes = [2, 32], strides = [1, 1]} : vector<2x96xf32> to vector<2x32xf32>
    %303 = vector.extract_strided_slice %291 {offsets = [0, 96], sizes = [2, 32], strides = [1, 1]} : vector<2x128xf32> to vector<2x32xf32>
    %304 = math.tanh %303 : vector<2x32xf32>
    %305 = arith.mulf %301, %255 : vector<2x32xf32>
    %306 = arith.mulf %300, %304 : vector<2x32xf32>
    %307 = arith.addf %305, %306 : vector<2x32xf32>
    %308 = math.tanh %307 : vector<2x32xf32>
    %309 = arith.mulf %302, %308 : vector<2x32xf32>
    %cst_66 = arith.constant 5.000000e-01 : f32
    %310 = vector.broadcast %cst_66 : f32 to vector<2x32xf32>
    %311 = arith.cmpf ogt, %309, %310 : vector<2x32xf32>
    %312 = arith.extui %311 : vector<2x32xi1> to vector<2x32xi32>
    %313 = arith.sitofp %312 : vector<2x32xi32> to vector<2x32xf32>
    %c0_67 = arith.constant 0 : index
    %c160 = arith.constant 160 : index
    %314 = vector.load %arg9[%c0_67, %c160] : memref<2x320xf32, #tpu.memory_space<vmem>>, vector<2x32xf32>
    tpu.vector_store %arg9[%c0_67, %c160], %313 {strides = array<i32>} : memref<2x320xf32, #tpu.memory_space<vmem>>, vector<2x32xf32>,
    %315 = arith.truncf %309 : vector<2x32xf32> to vector<2x32xbf16>
    %cst_68 = arith.constant dense<0.000000e+00> : vector<2x128xf32>
    %316 = tpu.matmul %315, %2, %cst_68 {dimension_numbers = #tpu.dot_dimension_numbers<[1], [0], [0], [1], [0, 0, 1, 1], [], []>} : vector<2x32xbf16>, vector<32x128xbf16>, vector<2x128xf32> -> vector<2x128xf32>
    %317 = arith.addf %316, %5 : vector<2x128xf32>
    %c6 = arith.constant 6 : index
    %c0_69 = arith.constant 0 : index
    %c0_70 = arith.constant 0 : index
    %318 = vector.load %arg1[%c6, %c0_69, %c0_70] : memref<8x2x128xf32, #tpu.memory_space<vmem>>, vector<1x2x128xf32>
    %319 = vector.shape_cast %318 : vector<1x2x128xf32> to vector<2x128xf32>
    %320 = arith.addf %319, %293 : vector<2x128xf32>
    %321 = vector.extract_strided_slice %320 {offsets = [0, 0], sizes = [2, 96], strides = [1, 1]} : vector<2x128xf32> to vector<2x96xf32>
    %322 = arith.negf %321 : vector<2x96xf32>
    %323 = math.exp %322 : vector<2x96xf32>
    %cst_71 = arith.constant 1.000000e+00 : f32
    %324 = vector.broadcast %cst_71 : f32 to vector<2x96xf32>
    %325 = arith.addf %324, %323 : vector<2x96xf32>
    %326 = arith.divf %324, %325 : vector<2x96xf32>
    %327 = vector.extract_strided_slice %326 {offsets = [0, 0], sizes = [2, 32], strides = [1, 1]} : vector<2x96xf32> to vector<2x32xf32>
    %328 = vector.extract_strided_slice %326 {offsets = [0, 32], sizes = [2, 32], strides = [1, 1]} : vector<2x96xf32> to vector<2x32xf32>
    %329 = vector.extract_strided_slice %326 {offsets = [0, 64], sizes = [2, 32], strides = [1, 1]} : vector<2x96xf32> to vector<2x32xf32>
    %330 = vector.extract_strided_slice %320 {offsets = [0, 96], sizes = [2, 32], strides = [1, 1]} : vector<2x128xf32> to vector<2x32xf32>
    %331 = math.tanh %330 : vector<2x32xf32>
    %332 = arith.mulf %328, %282 : vector<2x32xf32>
    %333 = arith.mulf %327, %331 : vector<2x32xf32>
    %334 = arith.addf %332, %333 : vector<2x32xf32>
    %335 = math.tanh %334 : vector<2x32xf32>
    %336 = arith.mulf %329, %335 : vector<2x32xf32>
    %cst_72 = arith.constant 5.000000e-01 : f32
    %337 = vector.broadcast %cst_72 : f32 to vector<2x32xf32>
    %338 = arith.cmpf ogt, %336, %337 : vector<2x32xf32>
    %339 = arith.extui %338 : vector<2x32xi1> to vector<2x32xi32>
    %340 = arith.sitofp %339 : vector<2x32xi32> to vector<2x32xf32>
    %341 = arith.truncf %340 : vector<2x32xf32> to vector<2x32xbf16>
    %cst_73 = arith.constant dense<0.000000e+00> : vector<2x128xf32>
    %342 = tpu.matmul %341, %1, %cst_73 {dimension_numbers = #tpu.dot_dimension_numbers<[1], [0], [0], [1], [0, 0, 1, 1], [], []>} : vector<2x32xbf16>, vector<32x128xbf16>, vector<2x128xf32> -> vector<2x128xf32>
    %343 = arith.addf %342, %317 : vector<2x128xf32>
    %344 = arith.truncf %336 : vector<2x32xf32> to vector<2x32xbf16>
    %cst_74 = arith.constant dense<0.000000e+00> : vector<2x128xf32>
    %345 = tpu.matmul %344, %0, %cst_74 {dimension_numbers = #tpu.dot_dimension_numbers<[1], [0], [0], [1], [0, 0, 1, 1], [], []>} : vector<2x32xbf16>, vector<32x128xbf16>, vector<2x128xf32> -> vector<2x128xf32>
    %346 = vector.extract_strided_slice %343 {offsets = [0, 0], sizes = [2, 96], strides = [1, 1]} : vector<2x128xf32> to vector<2x96xf32>
    %347 = arith.negf %346 : vector<2x96xf32>
    %348 = math.exp %347 : vector<2x96xf32>
    %cst_75 = arith.constant 1.000000e+00 : f32
    %349 = vector.broadcast %cst_75 : f32 to vector<2x96xf32>
    %350 = arith.addf %349, %348 : vector<2x96xf32>
    %351 = arith.divf %349, %350 : vector<2x96xf32>
    %352 = vector.extract_strided_slice %351 {offsets = [0, 0], sizes = [2, 32], strides = [1, 1]} : vector<2x96xf32> to vector<2x32xf32>
    %353 = vector.extract_strided_slice %351 {offsets = [0, 32], sizes = [2, 32], strides = [1, 1]} : vector<2x96xf32> to vector<2x32xf32>
    %354 = vector.extract_strided_slice %351 {offsets = [0, 64], sizes = [2, 32], strides = [1, 1]} : vector<2x96xf32> to vector<2x32xf32>
    %355 = vector.extract_strided_slice %343 {offsets = [0, 96], sizes = [2, 32], strides = [1, 1]} : vector<2x128xf32> to vector<2x32xf32>
    %356 = math.tanh %355 : vector<2x32xf32>
    %357 = arith.mulf %353, %307 : vector<2x32xf32>
    %358 = arith.mulf %352, %356 : vector<2x32xf32>
    %359 = arith.addf %357, %358 : vector<2x32xf32>
    %360 = math.tanh %359 : vector<2x32xf32>
    %361 = arith.mulf %354, %360 : vector<2x32xf32>
    %cst_76 = arith.constant 5.000000e-01 : f32
    %362 = vector.broadcast %cst_76 : f32 to vector<2x32xf32>
    %363 = arith.cmpf ogt, %361, %362 : vector<2x32xf32>
    %364 = arith.extui %363 : vector<2x32xi1> to vector<2x32xi32>
    %365 = arith.sitofp %364 : vector<2x32xi32> to vector<2x32xf32>
    %c0_77 = arith.constant 0 : index
    %c192 = arith.constant 192 : index
    %366 = vector.load %arg9[%c0_77, %c192] : memref<2x320xf32, #tpu.memory_space<vmem>>, vector<2x32xf32>
    tpu.vector_store %arg9[%c0_77, %c192], %365 {strides = array<i32>} : memref<2x320xf32, #tpu.memory_space<vmem>>, vector<2x32xf32>,
    %367 = arith.truncf %361 : vector<2x32xf32> to vector<2x32xbf16>
    %cst_78 = arith.constant dense<0.000000e+00> : vector<2x128xf32>
    %368 = tpu.matmul %367, %2, %cst_78 {dimension_numbers = #tpu.dot_dimension_numbers<[1], [0], [0], [1], [0, 0, 1, 1], [], []>} : vector<2x32xbf16>, vector<32x128xbf16>, vector<2x128xf32> -> vector<2x128xf32>
    %369 = arith.addf %368, %5 : vector<2x128xf32>
    %c7 = arith.constant 7 : index
    %c0_79 = arith.constant 0 : index
    %c0_80 = arith.constant 0 : index
    %370 = vector.load %arg1[%c7, %c0_79, %c0_80] : memref<8x2x128xf32, #tpu.memory_space<vmem>>, vector<1x2x128xf32>
    %371 = vector.shape_cast %370 : vector<1x2x128xf32> to vector<2x128xf32>
    %372 = arith.addf %371, %345 : vector<2x128xf32>
    %373 = vector.extract_strided_slice %372 {offsets = [0, 0], sizes = [2, 96], strides = [1, 1]} : vector<2x128xf32> to vector<2x96xf32>
    %374 = arith.negf %373 : vector<2x96xf32>
    %375 = math.exp %374 : vector<2x96xf32>
    %cst_81 = arith.constant 1.000000e+00 : f32
    %376 = vector.broadcast %cst_81 : f32 to vector<2x96xf32>
    %377 = arith.addf %376, %375 : vector<2x96xf32>
    %378 = arith.divf %376, %377 : vector<2x96xf32>
    %379 = vector.extract_strided_slice %378 {offsets = [0, 0], sizes = [2, 32], strides = [1, 1]} : vector<2x96xf32> to vector<2x32xf32>
    %380 = vector.extract_strided_slice %378 {offsets = [0, 32], sizes = [2, 32], strides = [1, 1]} : vector<2x96xf32> to vector<2x32xf32>
    %381 = vector.extract_strided_slice %378 {offsets = [0, 64], sizes = [2, 32], strides = [1, 1]} : vector<2x96xf32> to vector<2x32xf32>
    %382 = vector.extract_strided_slice %372 {offsets = [0, 96], sizes = [2, 32], strides = [1, 1]} : vector<2x128xf32> to vector<2x32xf32>
    %383 = math.tanh %382 : vector<2x32xf32>
    %384 = arith.mulf %380, %334 : vector<2x32xf32>
    %385 = arith.mulf %379, %383 : vector<2x32xf32>
    %386 = arith.addf %384, %385 : vector<2x32xf32>
    %387 = math.tanh %386 : vector<2x32xf32>
    %388 = arith.mulf %381, %387 : vector<2x32xf32>
    %cst_82 = arith.constant 5.000000e-01 : f32
    %389 = vector.broadcast %cst_82 : f32 to vector<2x32xf32>
    %390 = arith.cmpf ogt, %388, %389 : vector<2x32xf32>
    %391 = arith.extui %390 : vector<2x32xi1> to vector<2x32xi32>
    %392 = arith.sitofp %391 : vector<2x32xi32> to vector<2x32xf32>
    %393 = arith.truncf %392 : vector<2x32xf32> to vector<2x32xbf16>
    %cst_83 = arith.constant dense<0.000000e+00> : vector<2x128xf32>
    %394 = tpu.matmul %393, %1, %cst_83 {dimension_numbers = #tpu.dot_dimension_numbers<[1], [0], [0], [1], [0, 0, 1, 1], [], []>} : vector<2x32xbf16>, vector<32x128xbf16>, vector<2x128xf32> -> vector<2x128xf32>
    %395 = arith.addf %394, %369 : vector<2x128xf32>
    %396 = vector.extract_strided_slice %395 {offsets = [0, 0], sizes = [2, 96], strides = [1, 1]} : vector<2x128xf32> to vector<2x96xf32>
    %397 = arith.negf %396 : vector<2x96xf32>
    %398 = math.exp %397 : vector<2x96xf32>
    %cst_84 = arith.constant 1.000000e+00 : f32
    %399 = vector.broadcast %cst_84 : f32 to vector<2x96xf32>
    %400 = arith.addf %399, %398 : vector<2x96xf32>
    %401 = arith.divf %399, %400 : vector<2x96xf32>
    %402 = vector.extract_strided_slice %401 {offsets = [0, 0], sizes = [2, 32], strides = [1, 1]} : vector<2x96xf32> to vector<2x32xf32>
    %403 = vector.extract_strided_slice %401 {offsets = [0, 32], sizes = [2, 32], strides = [1, 1]} : vector<2x96xf32> to vector<2x32xf32>
    %404 = vector.extract_strided_slice %401 {offsets = [0, 64], sizes = [2, 32], strides = [1, 1]} : vector<2x96xf32> to vector<2x32xf32>
    %405 = vector.extract_strided_slice %395 {offsets = [0, 96], sizes = [2, 32], strides = [1, 1]} : vector<2x128xf32> to vector<2x32xf32>
    %406 = math.tanh %405 : vector<2x32xf32>
    %407 = arith.mulf %403, %359 : vector<2x32xf32>
    %408 = arith.mulf %402, %406 : vector<2x32xf32>
    %409 = arith.addf %407, %408 : vector<2x32xf32>
    %410 = math.tanh %409 : vector<2x32xf32>
    %411 = arith.mulf %404, %410 : vector<2x32xf32>
    %cst_85 = arith.constant 5.000000e-01 : f32
    %412 = vector.broadcast %cst_85 : f32 to vector<2x32xf32>
    %413 = arith.cmpf ogt, %411, %412 : vector<2x32xf32>
    %414 = arith.extui %413 : vector<2x32xi1> to vector<2x32xi32>
    %415 = arith.sitofp %414 : vector<2x32xi32> to vector<2x32xf32>
    %c0_86 = arith.constant 0 : index
    %c224 = arith.constant 224 : index
    %416 = vector.load %arg9[%c0_86, %c224] : memref<2x320xf32, #tpu.memory_space<vmem>>, vector<2x32xf32>
    tpu.vector_store %arg9[%c0_86, %c224], %415 {strides = array<i32>} : memref<2x320xf32, #tpu.memory_space<vmem>>, vector<2x32xf32>,
    %417 = arith.truncf %411 : vector<2x32xf32> to vector<2x32xbf16>
    %cst_87 = arith.constant dense<0.000000e+00> : vector<2x128xf32>
    %418 = tpu.matmul %417, %2, %cst_87 {dimension_numbers = #tpu.dot_dimension_numbers<[1], [0], [0], [1], [0, 0, 1, 1], [], []>} : vector<2x32xbf16>, vector<32x128xbf16>, vector<2x128xf32> -> vector<2x128xf32>
    %419 = arith.addf %418, %5 : vector<2x128xf32>
    %420 = arith.truncf %388 : vector<2x32xf32> to vector<2x32xbf16>
    %cst_88 = arith.constant dense<0.000000e+00> : vector<2x128xf32>
    %421 = tpu.matmul %420, %1, %cst_88 {dimension_numbers = #tpu.dot_dimension_numbers<[1], [0], [0], [1], [0, 0, 1, 1], [], []>} : vector<2x32xbf16>, vector<32x128xbf16>, vector<2x128xf32> -> vector<2x128xf32>
    %422 = arith.addf %421, %419 : vector<2x128xf32>
    %423 = vector.extract_strided_slice %422 {offsets = [0, 0], sizes = [2, 96], strides = [1, 1]} : vector<2x128xf32> to vector<2x96xf32>
    %424 = arith.negf %423 : vector<2x96xf32>
    %425 = math.exp %424 : vector<2x96xf32>
    %cst_89 = arith.constant 1.000000e+00 : f32
    %426 = vector.broadcast %cst_89 : f32 to vector<2x96xf32>
    %427 = arith.addf %426, %425 : vector<2x96xf32>
    %428 = arith.divf %426, %427 : vector<2x96xf32>
    %429 = vector.extract_strided_slice %428 {offsets = [0, 0], sizes = [2, 32], strides = [1, 1]} : vector<2x96xf32> to vector<2x32xf32>
    %430 = vector.extract_strided_slice %428 {offsets = [0, 32], sizes = [2, 32], strides = [1, 1]} : vector<2x96xf32> to vector<2x32xf32>
    %431 = vector.extract_strided_slice %428 {offsets = [0, 64], sizes = [2, 32], strides = [1, 1]} : vector<2x96xf32> to vector<2x32xf32>
    %432 = vector.extract_strided_slice %422 {offsets = [0, 96], sizes = [2, 32], strides = [1, 1]} : vector<2x128xf32> to vector<2x32xf32>
    %433 = math.tanh %432 : vector<2x32xf32>
    %434 = arith.mulf %430, %409 : vector<2x32xf32>
    %435 = arith.mulf %429, %433 : vector<2x32xf32>
    %436 = arith.addf %434, %435 : vector<2x32xf32>
    %437 = math.tanh %436 : vector<2x32xf32>
    %438 = arith.mulf %431, %437 : vector<2x32xf32>
    %cst_90 = arith.constant 5.000000e-01 : f32
    %439 = vector.broadcast %cst_90 : f32 to vector<2x32xf32>
    %440 = arith.cmpf ogt, %438, %439 : vector<2x32xf32>
    %441 = arith.extui %440 : vector<2x32xi1> to vector<2x32xi32>
    %442 = arith.sitofp %441 : vector<2x32xi32> to vector<2x32xf32>
    %c0_91 = arith.constant 0 : index
    %c256 = arith.constant 256 : index
    %443 = vector.load %arg9[%c0_91, %c256] : memref<2x320xf32, #tpu.memory_space<vmem>>, vector<2x32xf32>
    tpu.vector_store %arg9[%c0_91, %c256], %442 {strides = array<i32>} : memref<2x320xf32, #tpu.memory_space<vmem>>, vector<2x32xf32>,
    %c0_92 = arith.constant 0 : index
    %c288 = arith.constant 288 : index
    %444 = vector.load %arg9[%c0_92, %c288] : memref<2x320xf32, #tpu.memory_space<vmem>>, vector<2x32xf32>
    tpu.vector_store %arg9[%c0_92, %c288], %438 {strides = array<i32>} : memref<2x320xf32, #tpu.memory_space<vmem>>, vector<2x32xf32>,
    %c0_93 = arith.constant 0 : index
    %c0_94 = arith.constant 0 : index
    %445 = vector.load %arg9[%c0_93, %c0_94] : memref<2x320xf32, #tpu.memory_space<vmem>>, vector<2x320xf32>
    %446 = arith.truncf %445 : vector<2x320xf32> to vector<2x320xbf16>
    %c0_95 = arith.constant 0 : index
    %c0_96 = arith.constant 0 : index
    %447 = vector.load %arg6[%c0_95, %c0_96] : memref<320x2xbf16, #tpu.memory_space<vmem>>, vector<320x2xbf16>
    %cst_97 = arith.constant dense<0.000000e+00> : vector<2x2xf32>
    %448 = tpu.matmul %446, %447, %cst_97 {dimension_numbers = #tpu.dot_dimension_numbers<[1], [0], [0], [1], [0, 0, 1, 1], [], []>} : vector<2x320xbf16>, vector<320x2xbf16>, vector<2x2xf32> -> vector<2x2xf32>
    %c0_98 = arith.constant 0 : index
    %c0_99 = arith.constant 0 : index
    %449 = vector.load %arg7[%c0_98, %c0_99] : memref<1x2xf32, #tpu.memory_space<vmem>>, vector<1x2xf32>
    %450 = vector.shape_cast %449 : vector<1x2xf32> to vector<1x2xf32>
    %451 = vector.broadcast %450 : vector<1x2xf32> to vector<2x2xf32>
    %452 = arith.addf %448, %451 : vector<2x2xf32>
    %c0_100 = arith.constant 0 : index
    %c0_101 = arith.constant 0 : index
    %453 = vector.load %arg8[%c0_100, %c0_101] : memref<2x2xf32, #tpu.memory_space<vmem>>, vector<2x2xf32>
    tpu.vector_store %arg8[%c0_100, %c0_101], %452 {strides = array<i32>} : memref<2x2xf32, #tpu.memory_space<vmem>>, vector<2x2xf32>,
    return
  }
  func.func @transform_0(%arg0: i32) -> (i32, i32, i32) {
    %c0_i32 = arith.constant 0 : i32
    %c0_i32_0 = arith.constant 0 : i32
    %c0_i32_1 = arith.constant 0 : i32
    return %c0_i32, %arg0, %c0_i32_0 : i32, i32, i32
  }
  func.func @transform_1(%arg0: i32) -> (i32, i32) {
    %c0_i32 = arith.constant 0 : i32
    %c0_i32_0 = arith.constant 0 : i32
    %c0_i32_1 = arith.constant 0 : i32
    return %c0_i32, %c0_i32_0 : i32, i32
  }
  func.func @transform_2(%arg0: i32) -> (i32, i32) {
    %c0_i32 = arith.constant 0 : i32
    %c0_i32_0 = arith.constant 0 : i32
    %c0_i32_1 = arith.constant 0 : i32
    return %c0_i32, %c0_i32_0 : i32, i32
  }
  func.func @transform_3(%arg0: i32) -> (i32, i32) {
    %c0_i32 = arith.constant 0 : i32
    %c0_i32_0 = arith.constant 0 : i32
    %c0_i32_1 = arith.constant 0 : i32
    return %c0_i32, %c0_i32_0 : i32, i32
  }
  func.func @transform_4(%arg0: i32) -> (i32, i32) {
    %c0_i32 = arith.constant 0 : i32
    %c0_i32_0 = arith.constant 0 : i32
    %c0_i32_1 = arith.constant 0 : i32
    return %c0_i32, %c0_i32_0 : i32, i32
  }
  func.func @transform_5(%arg0: i32) -> (i32, i32) {
    %c0_i32 = arith.constant 0 : i32
    %c0_i32_0 = arith.constant 0 : i32
    %c0_i32_1 = arith.constant 0 : i32
    return %c0_i32, %c0_i32_0 : i32, i32
  }
  func.func @transform_6(%arg0: i32) -> (i32, i32) {
    %c0_i32 = arith.constant 0 : i32
    %c0_i32_0 = arith.constant 0 : i32
    %c0_i32_1 = arith.constant 0 : i32
    return %c0_i32, %c0_i32_0 : i32, i32
  }
  func.func @transform_7(%arg0: i32) -> (i32, i32) {
    %c0_i32 = arith.constant 0 : i32
    %c0_i32_0 = arith.constant 0 : i32
    return %arg0, %c0_i32 : i32, i32
  }
}

</mosaic_0001>

<bundles_post_ra>
// kernel: tpu_custom_call.1
= control target key start
LH: loop header
LB: loop body
LE: loop exit
PB: predicated region body
PF: predicated region fallthrough
CT: control target
= control target key end

     0   :  { %s2735_s26 = smov 32   ;;  %s3312_s0 = inlined_call_operand.vmem [shape: f32[8,2,128], index: 0, kind: input, shape index: {}]   ;;  %s3313_s1 = inlined_call_operand.vmem [shape: bf16[32,128], index: 1, kind: input, shape index: {}]   ;;  %s3314_s2 = inlined_call_operand.vmem [shape: bf16[32,128], index: 2, kind: input, shape index: {}]   ;;  %s3315_s3 = inlined_call_operand.vmem [shape: bf16[32,128], index: 3, kind: input, shape index: {}]   ;;  %s3316_s4 = inlined_call_operand.vmem [shape: f32[1,128], index: 4, kind: input, shape index: {}]   ;;  %s3317_s5 = inlined_call_operand.vmem [shape: bf16[320,2], index: 5, kind: input, shape index: {}]   ;;  %s3318_s6 = inlined_call_operand.vmem [shape: f32[1,2], index: 6, kind: input, shape index: {}]   ;;  %s3319_s7 = inlined_call_operand.hbm [shape: f32[2,2], index: 7, kind: output, shape index: {}]  }
   0x1   :  { %v47_v0 = vld [vmem:[%s3312_s0] sm:$0x3] }
   0x2   :  { %2572 = vtanh.f32 %v47_v0 }
   0xc   :  { %v2573_v1 = vpop.eup %2572 }
   0xd   :  { %57 = vrot.lane.b32.xlu0 %v2573_v1, %s2735_s26 }
   0xe   :  { %12 = vsyncpa [#allocation4], 0  ;;  %v2087_v2 = vmul.f32 -1.442695, %v47_v0  ;;  %v2736_v8 = vmov 0.0   ;;  %v2795_v12 = vld [vmem:[%s3314_s2] sm:$0xff]  }
   0xf   :  { %2279 = vmatprep.subr.bf16.mxu1 %v2736_v8  ;;  %2295 = vmatprep.subr.bf16.mxu0 %v2736_v8  ;;  %v2803_v14 = vld [vmem:[%s3314_s2 + $0x8] sm:$0xff]   ;;  %vm2737_vm0 = vmmov 0   ;;  %s2738_s8 = smov 64   ;;  %vm91_vm2 = vcmask 261120   ;;  %v2817_v20 = vld [vmem:[%s3313_s1] sm:$0xff]   ;;  %s2740_s21 = smov 96  }
  0x10   :  { %2574 = vpow2.f32 %v2087_v2  ;;  %2280 = vmatpush3.bf16.msra.mxu1 %v2795_v12  ;;  %2283 = vmatprep.mubr.msk.bf16.mxu1 %vm2737_vm0, %v2736_v8  ;;  %v2824_v22 = vld [vmem:[%s3313_s1 + $0x8] sm:$0xff]   ;;  %v2841_v24 = vld [vmem:[%s3316_s4] ss:$0 sm:$0xff]  ;;  %v2100_v30 = vld [vmem:[%s3312_s0 + $0x2] sm:$0x3] }
  0x11   :  { %2281 = vmatprep.subr.bf16.mxu1 %v2736_v8  ;;  %2299 = vmatprep.mubr.msk.bf16.mxu0 %vm2737_vm0, %v2736_v8  ;;  %v2862_v57 = vld [vmem:[%s3315_s3] sm:$0xff]   ;;  %v2868_v58 = vld [vmem:[%s3315_s3 + $0x8] sm:$0xff]  }
  0x12   :  { %2296 = vmatpush3.bf16.msra.mxu0 %v2862_v57 }
  0x13   :  { %2297 = vmatprep.subr.bf16.mxu0 %v2736_v8 }
  0x14   :  { %2282 = vmatpush3.bf16.msra.mxu1 %v2803_v14 }
  0x15   :  { %2287 = vmatprep.subr.bf16.mxu1 %v2736_v8 }
  0x16   :  { %2298 = vmatpush3.bf16.msra.mxu0 %v2868_v58 }
  0x17   :  { %2303 = vmatprep.subr.bf16.mxu0 %v2736_v8 }
  0x1a   :  { %v2575_v3 = vpop.eup %2574 }
  0x1b   :  { %v51_v4 = vadd.f32 1.0, %v2575_v3 }
  0x1d   :  { %2576 = vrcp.f32 %v51_v4 }
  0x27   :  { %v2577_v5 = vpop.eup %2576 }
  0x28   :  { %v55_v9 = vmul.f32 0.0, %v2577_v5 }
  0x7f   :  { %v58_v6 = vpop.permute.xlu0 %57 }
  0x80   :  { %v60_v7 = vmul.f32 %v2577_v5, %v58_v6 }
  0x82   :  { %62 = vrot.lane.b32.xlu0 %v60_v7, %s2735_s26  ;;  %v2108_v7 = vld [vmem:[%s3312_s0 + $0x4] sm:$0x3] }
  0xf4   :  { %v63_v10 = vpop.permute.xlu0 %62 }
  0xf5   :  { %v2789_v11 = vadd.f32 %v63_v10, %v55_v9 }
  0xf7   :  { %2578 = vtanh.f32 %v2789_v11 }
 0x101   :  { %v2579_v13 = vpop.eup %2578 }
 0x102   :  { %68 = vrot.lane.b32.xlu1 %v2579_v13, %s2735_s26 }
 0x174   :  { %v69_v15 = vpop.permute.xlu1 %68 }
 0x175   :  { %v71_v16 = vmul.f32 %v2577_v5, %v69_v15 }
 0x177   :  { %vm72_vm1 = vcmp.gt.f32.partialorder %v71_v16, 0.5  ;;  %v135_v17 = vpack.c.bf16 %v71_v16, %v71_v16 }
 0x178   :  { %v2088_v18 = vsel %vm72_vm1, 1.0, %v2736_v8 }
 0x179   :  { %v75_v19 = vpack.c.bf16 %v2088_v18, %v2088_v18  ;;  %137 = vrot.lane.b32.xlu0 %v135_v17, %s2738_s8 }
 0x17b   :  { %77 = vrot.lane.b32.xlu1 %v75_v19, %s2738_s8 }
 0x1eb   :  { %v138_v23 = vpop.permute.xlu0 %137 }
 0x1ed   :  { %v78_v21 = vpop.permute.xlu1 %77 }
 0x1ee   :  { %2284 = vmatmul.mubr.msk.bf16.vlgmr.msra.gmra.mrb[0].mxu1 %vm91_vm2, %v78_v21 }
 0x1ef   :  { %2288 = vmatpush3.bf16.msra.mxu1 %v2817_v20  ;;  %2291 = vmatprep.mubr.msk.bf16.mxu1 %vm2737_vm0, %v2736_v8 }
 0x1f0   :  { %2289 = vmatprep.subr.bf16.mxu1 %v2736_v8 }
 0x1f3   :  { %2290 = vmatpush3.bf16.msra.mxu1 %v2824_v22 }
 0x1f4   :  { %2311 = vmatprep.subr.bf16.mxu1 %v2736_v8 }
 0x1f6   :  { %2292 = vmatmul.mubr.msk.bf16.vlgmr.msra.gmra.mrb[4].mxu1 %vm91_vm2, %v138_v23 }
 0x1f7   :  { %2312 = vmatpush3.bf16.msra.mxu1 %v2817_v20  ;;  %2315 = vmatprep.mubr.msk.bf16.mxu1 %vm2737_vm0, %v2736_v8 }
 0x1f8   :  { %2313 = vmatprep.subr.bf16.mxu1 %v2736_v8 }
 0x1fb   :  { %2314 = vmatpush3.bf16.msra.mxu1 %v2824_v22 }
 0x1fc   :  { %2319 = vmatprep.subr.bf16.mxu1 %v2736_v8 }
 0x2c1   :  { %v129_v25 = vpop.f32.mrb[0].mxu1 }
 0x2c2   :  { %v130_v26 = vadd.f32 %v2841_v24, %v129_v25  ;;  %v2285_v27 = vpop.f32.mrb[1].mxu1 }
 0x2c3   :  { %v132_v28 = vpop.f32.mrb[2].mxu1 }
 0x2c4   :  { %2580 = vtanh.f32 %v130_v26  ;;  %v2286_v29 = vpop.f32.mrb[3].mxu1  ;;  %v2095_v38 = vmul.f32 -1.442695, %v130_v26 }
 0x2c9   :  { %v188_v31 = vpop.f32.mrb[4].mxu1 }
 0x2ca   :  { %v295_v32 = vadd.f32 %v2100_v30, %v188_v31  ;;  %v2293_v33 = vpop.f32.mrb[5].mxu1 }
 0x2cb   :  { %v191_v34 = vpop.f32.mrb[6].mxu1 }
 0x2cc   :  { %2582 = vtanh.f32 %v295_v32  ;;  %v2294_v35 = vpop.f32.mrb[7].mxu1  ;;  %v2101_v39 = vmul.f32 -1.442695, %v295_v32 }
 0x2cd   :  { %2584 = vpow2.f32 %v2095_v38 }
 0x2ce   :  { %v2581_v36 = vpop.eup %2580  ;;  %2586 = vpow2.f32 %v2101_v39 }
 0x2cf   :  { %203 = vrot.lane.b32.xlu1 %v2581_v36, %s2735_s26 }
 0x2d6   :  { %v2583_v37 = vpop.eup %2582 }
 0x2d7   :  { %305 = vrot.lane.b32.xlu0 %v2583_v37, %s2735_s26  ;;  %v2585_v40 = vpop.eup %2584 }
 0x2d8   :  { %v197_v41 = vadd.f32 1.0, %v2585_v40  ;;  %v2587_v42 = vpop.eup %2586 }
 0x2d9   :  { %v299_v43 = vadd.f32 1.0, %v2587_v42 }
 0x2da   :  { %2588 = vrcp.f32 %v197_v41 }
 0x2db   :  { %2590 = vrcp.f32 %v299_v43 }
 0x2e4   :  { %v2589_v44 = vpop.eup %2588 }
 0x2e5   :  { %v2591_v47 = vpop.eup %2590  ;;  %v201_v50 = vmul.f32 0.0, %v2589_v44 }
 0x2e6   :  { %v303_v53 = vmul.f32 %v2591_v47, %v2789_v11 }
 0x341   :  { %v204_v45 = vpop.permute.xlu1 %203 }
 0x342   :  { %v206_v46 = vmul.f32 %v2589_v44, %v204_v45 }
 0x344   :  { %208 = vrot.lane.b32.xlu1 %v206_v46, %s2735_s26 }
 0x349   :  { %v306_v48 = vpop.permute.xlu0 %305 }
 0x34a   :  { %v308_v49 = vmul.f32 %v2591_v47, %v306_v48 }
 0x34c   :  { %310 = vrot.lane.b32.xlu0 %v308_v49, %s2735_s26 }
 0x3b6   :  { %v209_v51 = vpop.permute.xlu1 %208 }
 0x3b7   :  { %v2851_v52 = vadd.f32 %v209_v51, %v201_v50 }
 0x3b9   :  { %2592 = vtanh.f32 %v2851_v52 }
 0x3be   :  { %v311_v54 = vpop.permute.xlu0 %310 }
 0x3bf   :  { %v2855_v55 = vadd.f32 %v311_v54, %v303_v53 }
 0x3c1   :  { %2594 = vtanh.f32 %v2855_v55 }
 0x3c3   :  { %v2593_v56 = vpop.eup %2592 }
 0x3c4   :  { %214 = vrot.lane.b32.xlu1 %v2593_v56, %s2735_s26 }
 0x3cb   :  { %v2595_v59 = vpop.eup %2594 }
 0x3cc   :  { %316 = vrot.lane.b32.xlu0 %v2595_v59, %s2735_s26  ;;  %v2116_v59 = vld [vmem:[%s3312_s0 + $0x6] sm:$0x3] }
 0x436   :  { %v215_v60 = vpop.permute.xlu1 %214 }
 0x437   :  { %v2874_v61 = vmul.f32 %v2589_v44, %v215_v60 }
 0x439   :  { %v234_v62 = vpack.c.bf16 %v2874_v61, %v2874_v61  ;;  %vm218_vm8 = vcmp.gt.f32.partialorder %v2874_v61, 0.5 }
 0x43b   :  { %236 = vrot.lane.b32.xlu1 %v234_v62, %s2738_s8 }
 0x43e   :  { %v317_v63 = vpop.permute.xlu0 %316 }
 0x43f   :  { %v319_v0 = vmul.f32 %v2591_v47, %v317_v63 }
 0x441   :  { %vm320_vm3 = vcmp.gt.f32.partialorder %v319_v0, 0.5  ;;  %v370_v1 = vpack.c.bf16 %v319_v0, %v319_v0 }
 0x442   :  { %v2102_v2 = vsel %vm320_vm3, 1.0, %v2736_v8 }
 0x443   :  { %v323_v3 = vpack.c.bf16 %v2102_v2, %v2102_v2  ;;  %372 = vrot.lane.b32.xlu1 %v370_v1, %s2738_s8 }
 0x445   :  { %325 = vrot.lane.b32.xlu0 %v323_v3, %s2738_s8 }
 0x4ad   :  { %v237_v4 = vpop.permute.xlu1 %236 }
 0x4ae   :  { %2300 = vmatmul.mubr.msk.bf16.vlgmr.msra.gmra.mrb[0].mxu0 %vm91_vm2, %v237_v4 }
 0x4af   :  { %2304 = vmatpush3.bf16.msra.mxu0 %v2795_v12  ;;  %2307 = vmatprep.mubr.msk.bf16.mxu0 %vm2737_vm0, %v2736_v8 }
 0x4b0   :  { %2305 = vmatprep.subr.bf16.mxu0 %v2736_v8 }
 0x4b3   :  { %2306 = vmatpush3.bf16.msra.mxu0 %v2803_v14 }
 0x4b4   :  { %2335 = vmatprep.subr.bf16.mxu0 %v2736_v8 }
 0x4b5   :  { %v373_v5 = vpop.permute.xlu1 %372 }
 0x4b6   :  { %2316 = vmatmul.mubr.msk.bf16.vlgmr.msra.gmra.mrb[8].mxu1 %vm91_vm2, %v373_v5 }
 0x4b7   :  { %2320 = vmatpush3.bf16.msra.mxu1 %v2862_v57  ;;  %2323 = vmatprep.mubr.msk.bf16.mxu1 %vm2737_vm0, %v2736_v8  ;;  %v326_v6 = vpop.permute.xlu0 %325 }
 0x4b8   :  { %2321 = vmatprep.subr.bf16.mxu1 %v2736_v8 }
 0x4ba   :  { %2308 = vmatmul.mubr.msk.bf16.vlgmr.msra.gmra.mrb[0].mxu0 %vm91_vm2, %v326_v6 }
 0x4bb   :  { %2322 = vmatpush3.bf16.msra.mxu1 %v2868_v58  ;;  %2336 = vmatpush3.bf16.msra.mxu0 %v2817_v20 }
 0x4bc   :  { %2327 = vmatprep.subr.bf16.mxu1 %v2736_v8  ;;  %2337 = vmatprep.subr.bf16.mxu0 %v2736_v8 }
 0x4bd   :  { %2339 = vmatprep.mubr.msk.bf16.mxu0 %vm2737_vm0, %v2736_v8 }
 0x4bf   :  { %2338 = vmatpush3.bf16.msra.mxu0 %v2824_v22 }
 0x4c0   :  { %2343 = vmatprep.subr.bf16.mxu0 %v2736_v8 }
 0x589   :  { %v411_v9 = vpop.f32.mrb[8].mxu1 }
 0x58a   :  { %v506_v10 = vadd.f32 %v2108_v7, %v411_v9  ;;  %v2317_v11 = vpop.f32.mrb[9].mxu1 }
 0x58b   :  { %v414_v13 = vpop.f32.mrb[10].mxu1 }
 0x58c   :  { %2596 = vtanh.f32 %v506_v10  ;;  %v2318_v15 = vpop.f32.mrb[11].mxu1  ;;  %v2109_v26 = vmul.f32 -1.442695, %v506_v10 }
 0x58d   :  { %v364_v16 = vpop.f32.mrb[0].mxu0 }
 0x58e   :  { %v2483_v17 = vadd.f32 %v2841_v24, %v364_v16  ;;  %v2309_v18 = vpop.f32.mrb[1].mxu0 }
 0x58f   :  { %v367_v19 = vpop.f32.mrb[2].mxu0 }
 0x590   :  { %2598 = vtanh.f32 %v2483_v17  ;;  %v2310_v21 = vpop.f32.mrb[3].mxu0  ;;  %v2105_v27 = vmul.f32 -1.442695, %v2483_v17 }
 0x591   :  { %2600 = vpow2.f32 %v2109_v26 }
 0x592   :  { %2602 = vpow2.f32 %v2105_v27 }
 0x596   :  { %v2597_v23 = vpop.eup %2596 }
 0x597   :  { %516 = vrot.lane.b32.xlu1 %v2597_v23, %s2735_s26 }
 0x59a   :  { %v2599_v25 = vpop.eup %2598 }
 0x59b   :  { %426 = vrot.lane.b32.xlu0 %v2599_v25, %s2735_s26  ;;  %v2601_v28 = vpop.eup %2600 }
 0x59c   :  { %v510_v29 = vadd.f32 1.0, %v2601_v28  ;;  %v2603_v30 = vpop.eup %2602 }
 0x59d   :  { %v420_v31 = vadd.f32 1.0, %v2603_v30 }
 0x59e   :  { %2604 = vrcp.f32 %v510_v29 }
 0x59f   :  { %2606 = vrcp.f32 %v420_v31 }
 0x5a8   :  { %v2605_v32 = vpop.eup %2604 }
 0x5a9   :  { %v2607_v35 = vpop.eup %2606  ;;  %v514_v38 = vmul.f32 %v2605_v32, %v2855_v55 }
 0x5aa   :  { %v424_v41 = vmul.f32 %v2607_v35, %v2851_v52 }
 0x609   :  { %v517_v33 = vpop.permute.xlu1 %516 }
 0x60a   :  { %v519_v34 = vmul.f32 %v2605_v32, %v517_v33 }
 0x60c   :  { %521 = vrot.lane.b32.xlu1 %v519_v34, %s2735_s26 }
 0x60d   :  { %v427_v36 = vpop.permute.xlu0 %426 }
 0x60e   :  { %v429_v37 = vmul.f32 %v2607_v35, %v427_v36 }
 0x610   :  { %431 = vrot.lane.b32.xlu0 %v429_v37, %s2735_s26 }
 0x67e   :  { %v522_v39 = vpop.permute.xlu1 %521 }
 0x67f   :  { %v2912_v40 = vadd.f32 %v522_v39, %v514_v38 }
 0x681   :  { %2608 = vtanh.f32 %v2912_v40 }
 0x682   :  { %v432_v42 = vpop.permute.xlu0 %431 }
 0x683   :  { %v2916_v43 = vadd.f32 %v432_v42, %v424_v41 }
 0x685   :  { %2610 = vtanh.f32 %v2916_v43 }
 0x68b   :  { %v2609_v44 = vpop.eup %2608 }
 0x68c   :  { %527 = vrot.lane.b32.xlu1 %v2609_v44, %s2735_s26 }
 0x68f   :  { %v2611_v45 = vpop.eup %2610 }
 0x690   :  { %437 = vrot.lane.b32.xlu0 %v2611_v45, %s2735_s26 }
 0x6fe   :  { %v528_v46 = vpop.permute.xlu1 %527 }
 0x6ff   :  { %v530_v47 = vmul.f32 %v2605_v32, %v528_v46  ;;  %v2124_v46 = vld [vmem:[%s3312_s0 + $0x8] sm:$0x3] }
 0x701   :  { %vm531_vm4 = vcmp.gt.f32.partialorder %v530_v47, 0.5  ;;  %v581_v53 = vpack.c.bf16 %v530_v47, %v530_v47 }
 0x702   :  { %v2110_v48 = vsel %vm531_vm4, 1.0, %v2736_v8  ;;  %v438_v49 = vpop.permute.xlu0 %437  ;;  %vm455_vm4 = vcmask 517376  }
 0x703   :  { %v534_v50 = vpack.c.bf16 %v2110_v48, %v2110_v48  ;;  %v2922_v51 = vmul.f32 %v2607_v35, %v438_v49 }
 0x705   :  { %v457_v52 = vpack.c.bf16 %v2922_v51, %v2922_v51  ;;  %536 = vrot.lane.b32.xlu1 %v534_v50, %s2738_s8  ;;  %vm441_vm11 = vcmp.gt.f32.partialorder %v2922_v51, 0.5 }
 0x707   :  { %459 = vrot.lane.b32.xlu0 %v457_v52, %s2738_s8 }
 0x70b   :  { %583 = vrot.lane.b32.xlu0 %v581_v53, %s2738_s8 }
 0x777   :  { %v537_v56 = vpop.permute.xlu1 %536 }
 0x779   :  { %v460_v54 = vpop.permute.xlu0 %459 }
 0x77a   :  { %2324 = vmatmul.mubr.msk.bf16.vlgmr.msra.gmra.mrb[12].mxu1 %vm91_vm2, %v460_v54 }
 0x77b   :  { %2328 = vmatpush3.bf16.msra.mxu1 %v2795_v12  ;;  %2331 = vmatprep.mubr.msk.bf16.mxu1 %vm2737_vm0, %v2736_v8 }
 0x77c   :  { %2329 = vmatprep.subr.bf16.mxu1 %v2736_v8 }
 0x77d   :  { %v584_v55 = vpop.permute.xlu0 %583 }
 0x77e   :  { %2340 = vmatmul.mubr.msk.bf16.vlgmr.msra.gmra.mrb[4].mxu0 %vm91_vm2, %v584_v55 }
 0x77f   :  { %2330 = vmatpush3.bf16.msra.mxu1 %v2803_v14  ;;  %2344 = vmatpush3.bf16.msra.mxu0 %v2862_v57 }
 0x780   :  { %2345 = vmatprep.subr.bf16.mxu0 %v2736_v8  ;;  %2359 = vmatprep.subr.bf16.mxu1 %v2736_v8 }
 0x781   :  { %2347 = vmatprep.mubr.msk.bf16.mxu0 %vm2737_vm0, %v2736_v8 }
 0x783   :  { %2346 = vmatpush3.bf16.msra.mxu0 %v2868_v58 }
 0x784   :  { %2351 = vmatprep.subr.bf16.mxu0 %v2736_v8 }
 0x786   :  { %2332 = vmatmul.mubr.msk.bf16.vlgmr.msra.gmra.mrb[12].mxu1 %vm91_vm2, %v537_v56 }
 0x787   :  { %2360 = vmatpush3.bf16.msra.mxu1 %v2817_v20  ;;  %2363 = vmatprep.mubr.msk.bf16.mxu1 %vm2737_vm0, %v2736_v8 }
 0x788   :  { %2361 = vmatprep.subr.bf16.mxu1 %v2736_v8 }
 0x78b   :  { %2362 = vmatpush3.bf16.msra.mxu1 %v2824_v22 }
 0x78c   :  { %2367 = vmatprep.subr.bf16.mxu1 %v2736_v8 }
 0x851   :  { %v622_v60 = vpop.f32.mrb[4].mxu0 }
 0x852   :  { %v706_v62 = vadd.f32 %v2116_v59, %v622_v60  ;;  %v2341_v63 = vpop.f32.mrb[5].mxu0 }
 0x853   :  { %v625_v0 = vpop.f32.mrb[6].mxu0 }
 0x854   :  { %2612 = vtanh.f32 %v706_v62  ;;  %v2342_v1 = vpop.f32.mrb[7].mxu0  ;;  %v2117_v10 = vmul.f32 -1.442695, %v706_v62 }
 0x859   :  { %v575_v2 = vpop.f32.mrb[12].mxu1 }
 0x85a   :  { %v2484_v3 = vadd.f32 %v2841_v24, %v575_v2  ;;  %v2333_v4 = vpop.f32.mrb[13].mxu1 }
 0x85b   :  { %v578_v5 = vpop.f32.mrb[14].mxu1 }
 0x85c   :  { %2614 = vtanh.f32 %v2484_v3  ;;  %v2334_v6 = vpop.f32.mrb[15].mxu1  ;;  %v2113_v11 = vmul.f32 -1.442695, %v2484_v3 }
 0x85d   :  { %2616 = vpow2.f32 %v2117_v10 }
 0x85e   :  { %v2613_v7 = vpop.eup %2612  ;;  %2618 = vpow2.f32 %v2113_v11 }
 0x85f   :  { %716 = vrot.lane.b32.xlu0 %v2613_v7, %s2735_s26 }
 0x866   :  { %v2615_v9 = vpop.eup %2614 }
 0x867   :  { %637 = vrot.lane.b32.xlu1 %v2615_v9, %s2735_s26  ;;  %v2617_v13 = vpop.eup %2616 }
 0x868   :  { %v710_v15 = vadd.f32 1.0, %v2617_v13  ;;  %v2619_v16 = vpop.eup %2618 }
 0x869   :  { %v631_v17 = vadd.f32 1.0, %v2619_v16 }
 0x86a   :  { %2620 = vrcp.f32 %v710_v15 }
 0x86b   :  { %2622 = vrcp.f32 %v631_v17 }
 0x874   :  { %v2621_v18 = vpop.eup %2620 }
 0x875   :  { %v2623_v23 = vpop.eup %2622  ;;  %v714_v27 = vmul.f32 %v2621_v18, %v2912_v40 }
 0x876   :  { %v635_v30 = vmul.f32 %v2623_v23, %v2916_v43 }
 0x8d1   :  { %v717_v19 = vpop.permute.xlu0 %716 }
 0x8d2   :  { %v719_v21 = vmul.f32 %v2621_v18, %v717_v19 }
 0x8d4   :  { %721 = vrot.lane.b32.xlu0 %v719_v21, %s2735_s26 }
 0x8d9   :  { %v638_v25 = vpop.permute.xlu1 %637 }
 0x8da   :  { %v640_v26 = vmul.f32 %v2623_v23, %v638_v25 }
 0x8dc   :  { %642 = vrot.lane.b32.xlu1 %v640_v26, %s2735_s26 }
 0x946   :  { %v722_v28 = vpop.permute.xlu0 %721 }
 0x947   :  { %v2959_v29 = vadd.f32 %v722_v28, %v714_v27 }
 0x949   :  { %2624 = vtanh.f32 %v2959_v29 }
 0x94e   :  { %v643_v31 = vpop.permute.xlu1 %642 }
 0x94f   :  { %v2963_v32 = vadd.f32 %v643_v31, %v635_v30 }
 0x951   :  { %2626 = vtanh.f32 %v2963_v32 }
 0x953   :  { %v2625_v33 = vpop.eup %2624 }
 0x954   :  { %727 = vrot.lane.b32.xlu0 %v2625_v33, %s2735_s26 }
 0x95b   :  { %v2627_v34 = vpop.eup %2626 }
 0x95c   :  { %648 = vrot.lane.b32.xlu1 %v2627_v34, %s2735_s26 }
 0x9c6   :  { %v728_v35 = vpop.permute.xlu0 %727 }
 0x9c7   :  { %v730_v36 = vmul.f32 %v2621_v18, %v728_v35 }
 0x9c9   :  { %vm731_vm5 = vcmp.gt.f32.partialorder %v730_v36, 0.5  ;;  %v781_v42 = vpack.c.bf16 %v730_v36, %v730_v36  ;;  %v2132_v36 = vld [vmem:[%s3312_s0 + $0xa] sm:$0x3] }
 0x9ca   :  { %v2118_v37 = vsel %vm731_vm5, 1.0, %v2736_v8  ;;  %vm655_vm5 = vcmask 779776  }
 0x9cb   :  { %v734_v38 = vpack.c.bf16 %v2118_v37, %v2118_v37 }
 0x9cd   :  { %736 = vrot.lane.b32.xlu0 %v734_v38, %s2738_s8 }
 0x9ce   :  { %v649_v39 = vpop.permute.xlu1 %648 }
 0x9cf   :  { %v2970_v40 = vmul.f32 %v2623_v23, %v649_v39 }
 0x9d1   :  { %v657_v41 = vpack.c.bf16 %v2970_v40, %v2970_v40 }
 0x9d3   :  { %659 = vrot.lane.b32.xlu1 %v657_v41, %s2738_s8 }
 0x9d7   :  { %783 = vrot.lane.b32.xlu1 %v781_v42, %s2738_s8 }
 0xa3f   :  { %v737_v45 = vpop.permute.xlu0 %736 }
 0xa45   :  { %v660_v43 = vpop.permute.xlu1 %659 }
 0xa46   :  { %2348 = vmatmul.mubr.msk.bf16.vlgmr.msra.gmra.mrb[8].mxu0 %vm91_vm2, %v660_v43 }
 0xa47   :  { %2352 = vmatpush3.bf16.msra.mxu0 %v2795_v12  ;;  %2355 = vmatprep.mubr.msk.bf16.mxu0 %vm2737_vm0, %v2736_v8 }
 0xa48   :  { %2353 = vmatprep.subr.bf16.mxu0 %v2736_v8 }
 0xa49   :  { %v784_v44 = vpop.permute.xlu1 %783 }
 0xa4a   :  { %2364 = vmatmul.mubr.msk.bf16.vlgmr.msra.gmra.mrb[16].mxu1 %vm91_vm2, %v784_v44 }
 0xa4b   :  { %2354 = vmatpush3.bf16.msra.mxu0 %v2803_v14  ;;  %2368 = vmatpush3.bf16.msra.mxu1 %v2862_v57 }
 0xa4c   :  { %2369 = vmatprep.subr.bf16.mxu1 %v2736_v8  ;;  %2383 = vmatprep.subr.bf16.mxu0 %v2736_v8 }
 0xa4d   :  { %2371 = vmatprep.mubr.msk.bf16.mxu1 %vm2737_vm0, %v2736_v8 }
 0xa4f   :  { %2370 = vmatpush3.bf16.msra.mxu1 %v2868_v58 }
 0xa50   :  { %2375 = vmatprep.subr.bf16.mxu1 %v2736_v8 }
 0xa52   :  { %2356 = vmatmul.mubr.msk.bf16.vlgmr.msra.gmra.mrb[8].mxu0 %vm91_vm2, %v737_v45 }
 0xa53   :  { %2384 = vmatpush3.bf16.msra.mxu0 %v2817_v20  ;;  %2387 = vmatprep.mubr.msk.bf16.mxu0 %vm2737_vm0, %v2736_v8 }
 0xa54   :  { %2385 = vmatprep.subr.bf16.mxu0 %v2736_v8 }
 0xa57   :  { %2386 = vmatpush3.bf16.msra.mxu0 %v2824_v22 }
 0xa58   :  { %2391 = vmatprep.subr.bf16.mxu0 %v2736_v8 }
 0xb1d   :  { %v822_v47 = vpop.f32.mrb[16].mxu1 }
 0xb1e   :  { %v917_v48 = vadd.f32 %v2124_v46, %v822_v47  ;;  %v2365_v49 = vpop.f32.mrb[17].mxu1 }
 0xb1f   :  { %v825_v50 = vpop.f32.mrb[18].mxu1 }
 0xb20   :  { %2628 = vtanh.f32 %v917_v48  ;;  %v2366_v52 = vpop.f32.mrb[19].mxu1  ;;  %v2125_v63 = vmul.f32 -1.442695, %v917_v48 }
 0xb25   :  { %v775_v53 = vpop.f32.mrb[8].mxu0 }
 0xb26   :  { %v2485_v54 = vadd.f32 %v2841_v24, %v775_v53  ;;  %v2357_v55 = vpop.f32.mrb[9].mxu0 }
 0xb27   :  { %v778_v56 = vpop.f32.mrb[10].mxu0 }
 0xb28   :  { %2630 = vtanh.f32 %v2485_v54  ;;  %v2358_v59 = vpop.f32.mrb[11].mxu0  ;;  %v2121_v0 = vmul.f32 -1.442695, %v2485_v54 }
 0xb29   :  { %2632 = vpow2.f32 %v2125_v63 }
 0xb2a   :  { %v2629_v60 = vpop.eup %2628  ;;  %2634 = vpow2.f32 %v2121_v0 }
 0xb2b   :  { %927 = vrot.lane.b32.xlu1 %v2629_v60, %s2735_s26 }
 0xb32   :  { %v2631_v62 = vpop.eup %2630 }
 0xb33   :  { %837 = vrot.lane.b32.xlu0 %v2631_v62, %s2735_s26  ;;  %v2633_v1 = vpop.eup %2632 }
 0xb34   :  { %v921_v2 = vadd.f32 1.0, %v2633_v1  ;;  %v2635_v3 = vpop.eup %2634 }
 0xb35   :  { %v831_v4 = vadd.f32 1.0, %v2635_v3 }
 0xb36   :  { %2636 = vrcp.f32 %v921_v2 }
 0xb37   :  { %2638 = vrcp.f32 %v831_v4 }
 0xb40   :  { %v2637_v5 = vpop.eup %2636 }
 0xb41   :  { %v2639_v9 = vpop.eup %2638  ;;  %v925_v13 = vmul.f32 %v2637_v5, %v2959_v29 }
 0xb42   :  { %v835_v17 = vmul.f32 %v2639_v9, %v2963_v32 }
 0xb9d   :  { %v928_v6 = vpop.permute.xlu1 %927 }
 0xb9e   :  { %v930_v7 = vmul.f32 %v2637_v5, %v928_v6 }
 0xba0   :  { %932 = vrot.lane.b32.xlu1 %v930_v7, %s2735_s26 }
 0xba5   :  { %v838_v10 = vpop.permute.xlu0 %837 }
 0xba6   :  { %v840_v11 = vmul.f32 %v2639_v9, %v838_v10 }
 0xba8   :  { %842 = vrot.lane.b32.xlu0 %v840_v11, %s2735_s26 }
 0xc12   :  { %v933_v15 = vpop.permute.xlu1 %932 }
 0xc13   :  { %v3006_v16 = vadd.f32 %v933_v15, %v925_v13  ;;  %v2739_v13 = vmov 1983009808  }
 0xc14   :  { %v223_v15 = vunpack.c.l.s4 %v2739_v13 }
 0xc15   :  { %2640 = vtanh.f32 %v3006_v16 }
 0xc1a   :  { %v843_v18 = vpop.permute.xlu0 %842 }
 0xc1b   :  { %v3010_v19 = vadd.f32 %v843_v18, %v835_v17 }
 0xc1d   :  { %2642 = vtanh.f32 %v3010_v19 }
 0xc1f   :  { %v2641_v21 = vpop.eup %2640 }
 0xc20   :  { %938 = vrot.lane.b32.xlu1 %v2641_v21, %s2735_s26 }
 0xc27   :  { %v2643_v23 = vpop.eup %2642 }
 0xc28   :  { %848 = vrot.lane.b32.xlu0 %v2643_v23, %s2735_s26 }
 0xc92   :  { %v939_v25 = vpop.permute.xlu1 %938 }
 0xc93   :  { %v941_v26 = vmul.f32 %v2637_v5, %v939_v25 }
 0xc95   :  { %vm942_vm6 = vcmp.gt.f32.partialorder %v941_v26, 0.5  ;;  %v992_v32 = vpack.c.bf16 %v941_v26, %v941_v26 }
 0xc96   :  { %v2126_v27 = vsel %vm942_vm6, 1.0, %v2736_v8  ;;  %vm866_vm6 = vcmask 1042176  }
 0xc97   :  { %v945_v28 = vpack.c.bf16 %v2126_v27, %v2126_v27 }
 0xc99   :  { %947 = vrot.lane.b32.xlu1 %v945_v28, %s2738_s8  ;;  %v2096_v28 = vsel %vm218_vm8, 1.0, %v2736_v8  ;;  %vm2070_vm8 = vcmask 9216  }
 0xc9a   :  { %v849_v29 = vpop.permute.xlu0 %848 }
 0xc9b   :  { %v3017_v30 = vmul.f32 %v2639_v9, %v849_v29 }
 0xc9d   :  { %v868_v31 = vpack.c.bf16 %v3017_v30, %v3017_v30  ;;  %vm852_vm14 = vcmp.gt.f32.partialorder %v3017_v30, 0.5 }
 0xc9f   :  { %870 = vrot.lane.b32.xlu0 %v868_v31, %s2738_s8 }
 0xca3   :  { %994 = vrot.lane.b32.xlu0 %v992_v32, %s2738_s8 }
 0xd0b   :  { %v948_v35 = vpop.permute.xlu1 %947 }
 0xd11   :  { %v871_v33 = vpop.permute.xlu0 %870 }
 0xd12   :  { %2372 = vmatmul.mubr.msk.bf16.vlgmr.msra.gmra.mrb[20].mxu1 %vm91_vm2, %v871_v33 }
 0xd13   :  { %2376 = vmatpush3.bf16.msra.mxu1 %v2795_v12  ;;  %2379 = vmatprep.mubr.msk.bf16.mxu1 %vm2737_vm0, %v2736_v8 }
 0xd14   :  { %2377 = vmatprep.subr.bf16.mxu1 %v2736_v8 }
 0xd15   :  { %v995_v34 = vpop.permute.xlu0 %994 }
 0xd16   :  { %2388 = vmatmul.mubr.msk.bf16.vlgmr.msra.gmra.mrb[12].mxu0 %vm91_vm2, %v995_v34 }
 0xd17   :  { %2378 = vmatpush3.bf16.msra.mxu1 %v2803_v14  ;;  %2392 = vmatpush3.bf16.msra.mxu0 %v2862_v57 }
 0xd18   :  { %2393 = vmatprep.subr.bf16.mxu0 %v2736_v8  ;;  %2407 = vmatprep.subr.bf16.mxu1 %v2736_v8 }
 0xd19   :  { %2395 = vmatprep.mubr.msk.bf16.mxu0 %vm2737_vm0, %v2736_v8 }
 0xd1b   :  { %2394 = vmatpush3.bf16.msra.mxu0 %v2868_v58 }
 0xd1c   :  { %2399 = vmatprep.subr.bf16.mxu0 %v2736_v8 }
 0xd1e   :  { %2380 = vmatmul.mubr.msk.bf16.vlgmr.msra.gmra.mrb[20].mxu1 %vm91_vm2, %v948_v35 }
 0xd1f   :  { %2408 = vmatpush3.bf16.msra.mxu1 %v2817_v20  ;;  %2411 = vmatprep.mubr.msk.bf16.mxu1 %vm2737_vm0, %v2736_v8 }
 0xd20   :  { %2409 = vmatprep.subr.bf16.mxu1 %v2736_v8 }
 0xd23   :  { %2410 = vmatpush3.bf16.msra.mxu1 %v2824_v22 }
 0xd24   :  { %2415 = vmatprep.subr.bf16.mxu1 %v2736_v8 }
 0xde9   :  { %v1033_v37 = vpop.f32.mrb[12].mxu0 }
 0xdea   :  { %v1127_v38 = vadd.f32 %v2132_v36, %v1033_v37  ;;  %v2389_v39 = vpop.f32.mrb[13].mxu0 }
 0xdeb   :  { %v1036_v41 = vpop.f32.mrb[14].mxu0 }
 0xdec   :  { %2644 = vtanh.f32 %v1127_v38  ;;  %v2390_v42 = vpop.f32.mrb[15].mxu0  ;;  %v2133_v50 = vmul.f32 -1.442695, %v1127_v38 }
 0xdf1   :  { %v986_v43 = vpop.f32.mrb[20].mxu1 }
 0xdf2   :  { %v2486_v44 = vadd.f32 %v2841_v24, %v986_v43  ;;  %v2381_v45 = vpop.f32.mrb[21].mxu1 }
 0xdf3   :  { %v989_v46 = vpop.f32.mrb[22].mxu1 }
 0xdf4   :  { %2646 = vtanh.f32 %v2486_v44  ;;  %v2382_v47 = vpop.f32.mrb[23].mxu1  ;;  %v2129_v52 = vmul.f32 -1.442695, %v2486_v44 }
 0xdf5   :  { %2648 = vpow2.f32 %v2133_v50 }
 0xdf6   :  { %v2645_v48 = vpop.eup %2644  ;;  %2650 = vpow2.f32 %v2129_v52 }
 0xdf7   :  { %1137 = vrot.lane.b32.xlu0 %v2645_v48, %s2735_s26 }
 0xdfe   :  { %v2647_v49 = vpop.eup %2646 }
 0xdff   :  { %1048 = vrot.lane.b32.xlu1 %v2647_v49, %s2735_s26  ;;  %v2649_v53 = vpop.eup %2648 }
 0xe00   :  { %v1131_v54 = vadd.f32 1.0, %v2649_v53  ;;  %v2651_v55 = vpop.eup %2650 }
 0xe01   :  { %v1042_v56 = vadd.f32 1.0, %v2651_v55 }
 0xe02   :  { %2652 = vrcp.f32 %v1131_v54 }
 0xe03   :  { %2654 = vrcp.f32 %v1042_v56 }
 0xe0c   :  { %v2653_v59 = vpop.eup %2652 }
 0xe0d   :  { %v2655_v63 = vpop.eup %2654  ;;  %v1135_v2 = vmul.f32 %v2653_v59, %v3006_v16  ;;  %v225_v16 = vlaneseq }
 0xe0e   :  { %v1046_v5 = vmul.f32 %v2655_v63, %v3010_v19  ;;  %v224_v19 = vunpack.c.0.s8 %v223_v15 }
 0xe0f   :  { %v226_v21 = vshrl.u32 %v225_v16, 7  ;;  %v2106_v16 = vsel %vm441_vm11, 1.0, %v2736_v8 }
 0xe11   :  { %v3065_v26 = vsub.s32 %v224_v19, %v226_v21 }
 0xe13   :  { %v228_v32 = vrot.slane %v2096_v28, %v3065_v26  ;;  %v451_v19 = vrot.slane %v2106_v16, %v3065_v26 }
 0xe69   :  { %v1138_v60 = vpop.permute.xlu0 %1137 }
 0xe6a   :  { %v1140_v62 = vmul.f32 %v2653_v59, %v1138_v60 }
 0xe6c   :  { %1142 = vrot.lane.b32.xlu0 %v1140_v62, %s2735_s26 }
 0xe71   :  { %v1049_v0 = vpop.permute.xlu1 %1048 }
 0xe72   :  { %v1051_v1 = vmul.f32 %v2655_v63, %v1049_v0 }
 0xe74   :  { %1053 = vrot.lane.b32.xlu1 %v1051_v1, %s2735_s26 }
 0xede   :  { %v1143_v3 = vpop.permute.xlu0 %1142 }
 0xedf   :  { %v3053_v4 = vadd.f32 %v1143_v3, %v1135_v2 }
 0xee1   :  { %2656 = vtanh.f32 %v3053_v4 }
 0xee6   :  { %v1054_v6 = vpop.permute.xlu1 %1053 }
 0xee7   :  { %v3057_v7 = vadd.f32 %v1054_v6, %v1046_v5 }
 0xee9   :  { %2658 = vtanh.f32 %v3057_v7 }
 0xeeb   :  { %v2657_v9 = vpop.eup %2656 }
 0xeec   :  { %1148 = vrot.lane.b32.xlu0 %v2657_v9, %s2735_s26 }
 0xef3   :  { %v2659_v10 = vpop.eup %2658 }
 0xef4   :  { %1059 = vrot.lane.b32.xlu1 %v2659_v10, %s2735_s26 }
 0xf5e   :  { %v1149_v11 = vpop.permute.xlu0 %1148 }
 0xf5f   :  { %v1151_v17 = vmul.f32 %v2653_v59, %v1149_v11 }
 0xf61   :  { %vm1152_vm7 = vcmp.gt.f32.partialorder %v1151_v17, 0.5  ;;  %v1202_v34 = vpack.c.bf16 %v1151_v17, %v1151_v17 }
 0xf62   :  { %v2134_v18 = vsel %vm1152_vm7, 1.0, %v2736_v8  ;;  %vm1986_vm7 = vcmask 523264  }
 0xf63   :  { %v1155_v23 = vpack.c.bf16 %v2134_v18, %v2134_v18 }
 0xf65   :  { %1157 = vrot.lane.b32.xlu0 %v1155_v23, %s2738_s8 }
 0xf66   :  { %v1060_v25 = vpop.permute.xlu1 %1059 }
 0xf67   :  { %v1062_v27 = vmul.f32 %v2655_v63, %v1060_v25 }
 0xf69   :  { %vm1063_vm9 = vcmp.gt.f32.partialorder %v1062_v27, 0.5  ;;  %v1078_v29 = vpack.c.bf16 %v1062_v27, %v1062_v27  ;;  %v3129_v27 = vld [vmem:[%s3314_s2] sm:$0xff]  }
 0xf6a   :  { %v2130_v31 = vsel %vm1063_vm9, 1.0, %v2736_v8 }
 0xf6b   :  { %v1073_v33 = vrot.slane %v2130_v31, %v3065_v26  ;;  %1080 = vrot.lane.b32.xlu1 %v1078_v29, %s2738_s8  ;;  %v3139_v29 = vld [vmem:[%s3314_s2 + $0x8] sm:$0xff]  }
 0xf6d   :  { %v3072_v61 = vpack.i.bf16 %v1073_v33, %v228_v32  ;;  %v2148_v32 = vld [vmem:[%s3312_s0 + $0xe] sm:$0x3] }
 0xf6f   :  { %1204 = vrot.lane.b32.xlu1 %v1202_v34, %s2738_s8 }
 0xfdd   :  { %v1081_v35 = vpop.permute.xlu1 %1080 }
 0xfde   :  { %2396 = vmatmul.mubr.msk.bf16.vlgmr.msra.gmra.mrb[16].mxu0 %vm91_vm2, %v1081_v35 }
 0xfdf   :  { %2400 = vmatpush3.bf16.msra.mxu0 %v2795_v12  ;;  %2403 = vmatprep.mubr.msk.bf16.mxu0 %vm2737_vm0, %v2736_v8  ;;  %v1158_v12 = vpop.permute.xlu0 %1157 }
 0xfe0   :  { %2401 = vmatprep.subr.bf16.mxu0 %v2736_v8 }
 0xfe1   :  { %v1205_v36 = vpop.permute.xlu1 %1204 }
 0xfe2   :  { %2412 = vmatmul.mubr.msk.bf16.vlgmr.msra.gmra.mrb[24].mxu1 %vm91_vm2, %v1205_v36 }
 0xfe3   :  { %2402 = vmatpush3.bf16.msra.mxu0 %v2803_v14  ;;  %2416 = vmatpush3.bf16.msra.mxu1 %v2862_v57  ;;  %v2140_v14 = vld [vmem:[%s3312_s0 + $0xc] sm:$0x3] }
 0xfe4   :  { %2417 = vmatprep.subr.bf16.mxu1 %v2736_v8  ;;  %2431 = vmatprep.subr.bf16.mxu0 %v2736_v8 }
 0xfe5   :  { %2419 = vmatprep.mubr.msk.bf16.mxu1 %vm2737_vm0, %v2736_v8 }
 0xfe7   :  { %2418 = vmatpush3.bf16.msra.mxu1 %v2868_v58 }
 0xfe8   :  { %2423 = vmatprep.subr.bf16.mxu1 %v2736_v8 }
 0xfea   :  { %2404 = vmatmul.mubr.msk.bf16.vlgmr.msra.gmra.mrb[16].mxu0 %vm91_vm2, %v1158_v12 }
 0xfeb   :  { %2432 = vmatpush3.bf16.msra.mxu0 %v2817_v20  ;;  %2435 = vmatprep.mubr.msk.bf16.mxu0 %vm2737_vm0, %v2736_v8 }
 0xfec   :  { %2433 = vmatprep.subr.bf16.mxu0 %v2736_v8 }
 0xfef   :  { %2434 = vmatpush3.bf16.msra.mxu0 %v2824_v22 }
 0xff0   :  { %2439 = vmatprep.subr.bf16.mxu0 %v2736_v8 }
0x10b5   :  { %v1243_v37 = vpop.f32.mrb[24].mxu1 }
0x10b6   :  { %v1337_v38 = vadd.f32 %v2140_v14, %v1243_v37  ;;  %v2413_v39 = vpop.f32.mrb[25].mxu1  ;;  %v3162_v14 = vld [vmem:[%s3316_s4] ss:$0 sm:$0xff] }
0x10b7   :  { %v1246_v41 = vpop.f32.mrb[26].mxu1 }
0x10b8   :  { %2660 = vtanh.f32 %v1337_v38  ;;  %v2414_v42 = vpop.f32.mrb[27].mxu1  ;;  %v2141_v48 = vmul.f32 -1.442695, %v1337_v38 }
0x10bd   :  { %v1196_v20 = vpop.f32.mrb[16].mxu0 }
0x10be   :  { %v2487_v43 = vadd.f32 %v2841_v24, %v1196_v20  ;;  %v2405_v44 = vpop.f32.mrb[17].mxu0 }
0x10bf   :  { %v1199_v45 = vpop.f32.mrb[18].mxu0 }
0x10c0   :  { %2662 = vtanh.f32 %v2487_v43  ;;  %v2406_v46 = vpop.f32.mrb[19].mxu0  ;;  %v2137_v49 = vmul.f32 -1.442695, %v2487_v43 }
0x10c1   :  { %2664 = vpow2.f32 %v2141_v48 }
0x10c2   :  { %v2661_v22 = vpop.eup %2660  ;;  %2666 = vpow2.f32 %v2137_v49 }
0x10c3   :  { %1347 = vrot.lane.b32.xlu1 %v2661_v22, %s2735_s26 }
0x10ca   :  { %v2663_v47 = vpop.eup %2662 }
0x10cb   :  { %1258 = vrot.lane.b32.xlu0 %v2663_v47, %s2735_s26  ;;  %v2665_v50 = vpop.eup %2664 }
0x10cc   :  { %v1341_v52 = vadd.f32 1.0, %v2665_v50  ;;  %v2667_v53 = vpop.eup %2666 }
0x10cd   :  { %v1252_v54 = vadd.f32 1.0, %v2667_v53 }
0x10ce   :  { %2668 = vrcp.f32 %v1341_v52 }
0x10cf   :  { %2670 = vrcp.f32 %v1252_v54 }
0x10d8   :  { %v2669_v24 = vpop.eup %2668 }
0x10d9   :  { %v2671_v59 = vpop.eup %2670  ;;  %v1345_v63 = vmul.f32 %v2669_v24, %v3053_v4 }
0x10da   :  { %v1256_v2 = vmul.f32 %v2671_v59, %v3057_v7 }
0x1135   :  { %v1348_v55 = vpop.permute.xlu1 %1347 }
0x1136   :  { %v1350_v56 = vmul.f32 %v2669_v24, %v1348_v55 }
0x1138   :  { %1352 = vrot.lane.b32.xlu1 %v1350_v56, %s2735_s26 }
0x113d   :  { %v1259_v60 = vpop.permute.xlu0 %1258 }
0x113e   :  { %v1261_v62 = vmul.f32 %v2671_v59, %v1259_v60 }
0x1140   :  { %1263 = vrot.lane.b32.xlu0 %v1261_v62, %s2735_s26 }
0x11aa   :  { %v1353_v0 = vpop.permute.xlu1 %1352 }
0x11ab   :  { %v3105_v1 = vadd.f32 %v1353_v0, %v1345_v63 }
0x11ad   :  { %2672 = vtanh.f32 %v3105_v1 }
0x11b2   :  { %v1264_v3 = vpop.permute.xlu0 %1263 }
0x11b3   :  { %v3109_v5 = vadd.f32 %v1264_v3, %v1256_v2 }
0x11b5   :  { %2674 = vtanh.f32 %v3109_v5 }
0x11b7   :  { %v2673_v6 = vpop.eup %2672 }
0x11b8   :  { %1358 = vrot.lane.b32.xlu1 %v2673_v6, %s2735_s26 }
0x11bf   :  { %v2675_v9 = vpop.eup %2674 }
0x11c0   :  { %1269 = vrot.lane.b32.xlu0 %v2675_v9, %s2735_s26 }
0x122a   :  { %v1359_v10 = vpop.permute.xlu1 %1358 }
0x122b   :  { %v1361_v4 = vmul.f32 %v2669_v24, %v1359_v10 }
0x122d   :  { %vm1362_vm10 = vcmp.gt.f32.partialorder %v1361_v4, 0.5  ;;  %v1412_v23 = vpack.c.bf16 %v1361_v4, %v1361_v4 }
0x122e   :  { %v2142_v11 = vsel %vm1362_vm10, 1.0, %v2736_v8 }
0x122f   :  { %v1365_v13 = vpack.c.bf16 %v2142_v11, %v2142_v11 }
0x1231   :  { %1367 = vrot.lane.b32.xlu1 %v1365_v13, %s2738_s8 }
0x1232   :  { %v1270_v7 = vpop.permute.xlu0 %1269 }
0x1233   :  { %v1272_v15 = vmul.f32 %v2671_v59, %v1270_v7 }
0x1235   :  { %vm1273_vm12 = vcmp.gt.f32.partialorder %v1272_v15, 0.5  ;;  %v1288_v17 = vpack.c.bf16 %v1272_v15, %v1272_v15 }
0x1236   :  { %v2138_v18 = vsel %vm1273_vm12, 1.0, %v2736_v8 }
0x1237   :  { %v1283_v21 = vrot.slane %v2138_v18, %v3065_v26  ;;  %1290 = vrot.lane.b32.xlu0 %v1288_v17, %s2738_s8 }
0x1239   :  { %v3122_v25 = vpack.i.bf16 %v1283_v21, %v451_v19 }
0x123b   :  { %1414 = vrot.lane.b32.xlu0 %v1412_v23, %s2738_s8 }
0x12a3   :  { %v1368_v31 = vpop.permute.xlu1 %1367 }
0x12a9   :  { %v1291_v51 = vpop.permute.xlu0 %1290 }
0x12aa   :  { %2420 = vmatmul.mubr.msk.bf16.vlgmr.msra.gmra.mrb[28].mxu1 %vm91_vm2, %v1291_v51 }
0x12ab   :  { %2424 = vmatpush3.bf16.msra.mxu1 %v3129_v27  ;;  %2427 = vmatprep.mubr.msk.bf16.mxu1 %vm2737_vm0, %v2736_v8 }
0x12ac   :  { %2425 = vmatprep.subr.bf16.mxu1 %v2736_v8 }
0x12ad   :  { %v1415_v28 = vpop.permute.xlu0 %1414 }
0x12ae   :  { %2436 = vmatmul.mubr.msk.bf16.vlgmr.msra.gmra.mrb[20].mxu0 %vm91_vm2, %v1415_v28 }
0x12af   :  { %2426 = vmatpush3.bf16.msra.mxu1 %v3139_v29  ;;  %2440 = vmatpush3.bf16.msra.mxu0 %v2862_v57 }
0x12b0   :  { %2441 = vmatprep.subr.bf16.mxu0 %v2736_v8  ;;  %2443 = vmatprep.mubr.msk.bf16.mxu0 %vm2737_vm0, %v2736_v8 }
0x12b1   :  { %2455 = vmatprep.subr.bf16.mxu1 %v2736_v8 }
0x12b3   :  { %2442 = vmatpush3.bf16.msra.mxu0 %v2868_v58 }
0x12b4   :  { %2447 = vmatprep.subr.bf16.mxu0 %v2736_v8 }
0x12b6   :  { %2428 = vmatmul.mubr.msk.bf16.vlgmr.msra.gmra.mrb[28].mxu1 %vm91_vm2, %v1368_v31 }
0x12b7   :  { %2456 = vmatpush3.bf16.msra.mxu1 %v2862_v57  ;;  %2459 = vmatprep.mubr.msk.bf16.mxu1 %vm2737_vm0, %v2736_v8 }
0x12b8   :  { %2457 = vmatprep.subr.bf16.mxu1 %v2736_v8 }
0x12bb   :  { %2458 = vmatpush3.bf16.msra.mxu1 %v2868_v58 }
0x12bc   :  { %2463 = vmatprep.subr.bf16.mxu1 %v2736_v8 }
0x1381   :  { %v1453_v33 = vpop.f32.mrb[20].mxu0 }
0x1382   :  { %v1536_v34 = vadd.f32 %v2148_v32, %v1453_v33  ;;  %v2437_v35 = vpop.f32.mrb[21].mxu0 }
0x1383   :  { %v1456_v36 = vpop.f32.mrb[22].mxu0 }
0x1384   :  { %2676 = vtanh.f32 %v1536_v34  ;;  %v2438_v12 = vpop.f32.mrb[23].mxu0  ;;  %v2149_v20 = vmul.f32 -1.442695, %v1536_v34 }
0x1389   :  { %v1406_v57 = vpop.f32.mrb[28].mxu1 }
0x138a   :  { %v2488_v58 = vadd.f32 %v3162_v14, %v1406_v57  ;;  %v2429_v37 = vpop.f32.mrb[29].mxu1  ;;  %v2122_v57 = vsel %vm852_vm14, 1.0, %v2736_v8 }
0x138b   :  { %v1409_v38 = vpop.f32.mrb[30].mxu1 }
0x138c   :  { %2678 = vtanh.f32 %v2488_v58  ;;  %v2430_v39 = vpop.f32.mrb[31].mxu1  ;;  %v2145_v43 = vmul.f32 -1.442695, %v2488_v58  ;;  %v862_v38 = vrot.slane %v2122_v57, %v3065_v26 }
0x138d   :  { %2680 = vpow2.f32 %v2149_v20 }
0x138e   :  { %v2677_v41 = vpop.eup %2676  ;;  %2682 = vpow2.f32 %v2145_v43 }
0x138f   :  { %1546 = vrot.lane.b32.xlu0 %v2677_v41, %s2735_s26 }
0x1396   :  { %v2679_v42 = vpop.eup %2678 }
0x1397   :  { %1468 = vrot.lane.b32.xlu1 %v2679_v42, %s2735_s26  ;;  %v2681_v44 = vpop.eup %2680 }
0x1398   :  { %v1540_v45 = vadd.f32 1.0, %v2681_v44  ;;  %v2683_v46 = vpop.eup %2682 }
0x1399   :  { %v1462_v22 = vadd.f32 1.0, %v2683_v46 }
0x139a   :  { %2684 = vrcp.f32 %v1540_v45 }
0x139b   :  { %2686 = vrcp.f32 %v1462_v22 }
0x13a4   :  { %v2685_v47 = vpop.eup %2684 }
0x13a5   :  { %v2687_v50 = vpop.eup %2686  ;;  %v1544_v54 = vmul.f32 %v2685_v47, %v3105_v1 }
0x13a6   :  { %v1466_v56 = vmul.f32 %v2687_v50, %v3109_v5 }
0x1401   :  { %v1547_v48 = vpop.permute.xlu0 %1546 }
0x1402   :  { %v1549_v49 = vmul.f32 %v2685_v47, %v1547_v48 }
0x1404   :  { %1551 = vrot.lane.b32.xlu0 %v1549_v49, %s2735_s26 }
0x1409   :  { %v1469_v52 = vpop.permute.xlu1 %1468 }
0x140a   :  { %v1471_v53 = vmul.f32 %v2687_v50, %v1469_v52 }
0x140c   :  { %1473 = vrot.lane.b32.xlu1 %v1471_v53, %s2735_s26 }
0x1476   :  { %v1552_v24 = vpop.permute.xlu0 %1551 }
0x1477   :  { %v1554_v55 = vadd.f32 %v1552_v24, %v1544_v54 }
0x1479   :  { %2688 = vtanh.f32 %v1554_v55 }
0x147e   :  { %v1474_v59 = vpop.permute.xlu1 %1473 }
0x147f   :  { %v1476_v60 = vadd.f32 %v1474_v59, %v1466_v56  ;;  %v2551_v56 = vld [vmem:[%s3317_s5 + $0x40] sm:$0xff]   ;;  %v2553_v59 = vld [vmem:[%s3317_s5 + $0x48] sm:$0xff]  }
0x1481   :  { %2690 = vtanh.f32 %v1476_v60 }
0x1483   :  { %v2689_v62 = vpop.eup %2688 }
0x1484   :  { %1557 = vrot.lane.b32.xlu0 %v2689_v62, %s2735_s26  ;;  %v2554_v62 = vld [vmem:[%s3317_s5 + $0x8] sm:$0xff]  }
0x148b   :  { %v2691_v63 = vpop.eup %2690 }
0x148c   :  { %1479 = vrot.lane.b32.xlu1 %v2691_v63, %s2735_s26  ;;  %v2555_v63 = vld [vmem:[%s3317_s5 + $0x50] sm:$0xff]  }
0x14f6   :  { %v1558_v0 = vpop.permute.xlu0 %1557 }
0x14f7   :  { %v1560_v2 = vmul.f32 %v2685_v47, %v1558_v0  ;;  %v2556_v0 = vld [vmem:[%s3317_s5 + $0x10] sm:$0xff]  }
0x14f9   :  { %vm1561_vm13 = vcmp.gt.f32.partialorder %v1560_v2, 0.5  ;;  %v1697_v35 = vpack.c.bf16 %v1560_v2, %v1560_v2  ;;  %v2557_v2 = vld [vmem:[%s3317_s5 + $0x58] sm:$0xff]  }
0x14fa   :  { %v2150_v3 = vsel %vm1561_vm13, 1.0, %v2736_v8 }
0x14fb   :  { %v1564_v1 = vpack.c.bf16 %v2150_v3, %v2150_v3  ;;  %v2558_v3 = vld [vmem:[%s3317_s5 + $0x18] sm:$0xff]  }
0x14fd   :  { %1566 = vrot.lane.b32.xlu0 %v1564_v1, %s2738_s8  ;;  %v2560_v1 = vld [vmem:[%s3317_s5 + $0x80] sm:$0xff]  }
0x14fe   :  { %v1480_v6 = vpop.permute.xlu1 %1479 }
0x14ff   :  { %v3175_v9 = vmul.f32 %v2687_v50, %v1480_v6  ;;  %v2561_v6 = vld [vmem:[%s3317_s5 + $0x20] sm:$0xff]  }
0x1501   :  { %v1487_v5 = vpack.c.bf16 %v3175_v9, %v3175_v9  ;;  %vm1483_vm3 = vcmp.gt.f32.partialorder %v3175_v9, 0.5 }
0x1503   :  { %1489 = vrot.lane.b32.xlu1 %v1487_v5, %s2738_s8  ;;  %v2562_v5 = vld [vmem:[%s3317_s5 + $0x68] sm:$0xff]  }
0x156f   :  { %v1567_v4 = vpop.permute.xlu0 %1566 }
0x1575   :  { %v1490_v10 = vpop.permute.xlu1 %1489 }
0x1576   :  { %2444 = vmatmul.mubr.msk.bf16.vlgmr.msra.gmra.mrb[24].mxu0 %vm91_vm2, %v1490_v10  ;;  %v2563_v10 = vld [vmem:[%s3317_s5 + $0x88] sm:$0xff]  }
0x1577   :  { %2448 = vmatpush3.bf16.msra.mxu0 %v3129_v27  ;;  %2451 = vmatprep.mubr.msk.bf16.mxu0 %vm2737_vm0, %v2736_v8 }
0x1578   :  { %2449 = vmatprep.subr.bf16.mxu0 %v2736_v8 }
0x157b   :  { %2450 = vmatpush3.bf16.msra.mxu0 %v3139_v29 }
0x157c   :  { %2252 = vmatprep.subr.bf16.mxu0 %v2551_v56 }
0x1582   :  { %2452 = vmatmul.mubr.msk.bf16.vlgmr.msra.gmra.mrb[24].mxu0 %vm91_vm2, %v1567_v4  ;;  %v2564_v4 = vld [vmem:[%s3317_s5 + $0x28] sm:$0xff]  }
0x1655   :  { %v1605_v11 = vpop.f32.mrb[24].mxu0 }
0x1656   :  { %v2489_v13 = vadd.f32 %v3162_v14, %v1605_v11  ;;  %v2453_v7 = vpop.f32.mrb[25].mxu0  ;;  %v2565_v11 = vld [vmem:[%s3317_s5 + $0x70] sm:$0xff]  }
0x1657   :  { %v1608_v15 = vpop.f32.mrb[26].mxu0  ;;  %v2566_v7 = vld [vmem:[%s3317_s5 + $0x90] sm:$0xff]  }
0x1658   :  { %2692 = vtanh.f32 %v2489_v13  ;;  %v2454_v16 = vpop.f32.mrb[27].mxu0  ;;  %v2152_v18 = vmul.f32 -1.442695, %v2489_v13 }
0x1659   :  { %v2567_v16 = vld [vmem:[%s3317_s5 + $0x30] sm:$0xff]  }
0x165a   :  { %2694 = vpow2.f32 %v2152_v18 }
0x1662   :  { %v2693_v17 = vpop.eup %2692 }
0x1663   :  { %1620 = vrot.lane.b32.xlu1 %v2693_v17, %s2735_s26  ;;  %v2568_v17 = vld [vmem:[%s3317_s5 + $0x78] sm:$0xff]  }
0x1664   :  { %v2695_v19 = vpop.eup %2694 }
0x1665   :  { %v1614_v21 = vadd.f32 1.0, %v2695_v19 }
0x1667   :  { %2696 = vrcp.f32 %v1614_v21  ;;  %v2569_v21 = vld [vmem:[%s3317_s5 + $0x98] sm:$0xff]  }
0x1671   :  { %v2697_v23 = vpop.eup %2696 }
0x1672   :  { %v1618_v31 = vmul.f32 %v2697_v23, %v1476_v60 }
0x16d5   :  { %v1621_v51 = vpop.permute.xlu1 %1620 }
0x16d6   :  { %v1623_v28 = vmul.f32 %v2697_v23, %v1621_v51 }
0x16d8   :  { %1625 = vrot.lane.b32.xlu0 %v1623_v28, %s2735_s26 }
0x174a   :  { %v1626_v32 = vpop.permute.xlu0 %1625 }
0x174b   :  { %v1628_v33 = vadd.f32 %v1626_v32, %v1618_v31  ;;  %v2146_v31 = vsel %vm1483_vm3, 1.0, %v2736_v8 }
0x174d   :  { %2698 = vtanh.f32 %v1628_v33 }
0x1757   :  { %v2699_v34 = vpop.eup %2698 }
0x1758   :  { %1631 = vrot.lane.b32.xlu1 %v2699_v34, %s2735_s26 }
0x175c   :  { %1699 = vrot.lane.b32.xlu1 %v1697_v35, %s2738_s8 }
0x17ca   :  { %v1632_v36 = vpop.permute.xlu1 %1631 }
0x17cb   :  { %v1634_v12 = vmul.f32 %v2697_v23, %v1632_v36 }
0x17cd   :  { %vm1635_vm15 = vcmp.gt.f32.partialorder %v1634_v12, 0.5  ;;  %v1650_v58 = vpack.c.bf16 %v1634_v12, %v1634_v12 }
0x17ce   :  { %v2153_v37 = vsel %vm1635_vm15, 1.0, %v2736_v8  ;;  %v1700_v30 = vpop.permute.xlu1 %1699 }
0x17cf   :  { %v1645_v39 = vrot.slane %v2153_v37, %v3065_v26  ;;  %1652 = vrot.lane.b32.xlu0 %v1650_v58, %s2738_s8 }
0x17d1   :  { %v2540_v41 = vpack.i.bf16 %v1645_v39, %v862_v38 }
0x1841   :  { %v1653_v42 = vpop.permute.xlu0 %1652 }
0x1842   :  { %2460 = vmatmul.mubr.msk.bf16.vlgmr.msra.gmra.mrb[32].mxu1 %vm91_vm2, %v1653_v42 }
0x1843   :  { %2464 = vmatpush3.bf16.msra.mxu1 %v3129_v27  ;;  %2467 = vmatprep.mubr.msk.bf16.mxu1 %vm2737_vm0, %v2736_v8 }
0x1844   :  { %2465 = vmatprep.subr.bf16.mxu1 %v2736_v8 }
0x1847   :  { %2466 = vmatpush3.bf16.msra.mxu1 %v3139_v29 }
0x1848   :  { %2471 = vmatprep.subr.bf16.mxu1 %v2736_v8 }
0x184e   :  { %2468 = vmatmul.mubr.msk.bf16.vlgmr.msra.gmra.mrb[32].mxu1 %vm91_vm2, %v1700_v30  ;;  %vm652_vm2 = vcmp.gt.f32.partialorder %v2970_v40, 0.5  ;;  %v2570_v40 = vld [vmem:[%s3317_s5 + $0x38] sm:$0xff]  }
0x184f   :  { %2479 = vmatprep.mubr.msk.bf16.mxu1 %vm2737_vm0, %v2736_v8  ;;  %vm232_vm0 = vcmask 254976   ;;  %2472 = vmatpush3.bf16.msra.mxu1 %v2560_v1  ;;  %v2114_v9 = vsel %vm652_vm2, 1.0, %v2736_v8 }
0x1850   :  { %2473 = vmatprep.subr.bf16.mxu1 %v2736_v8 }
0x1853   :  { %2474 = vmatpush3.bf16.msra.mxu1 %v2563_v10 }
0x1854   :  { %2475 = vmatprep.subr.bf16.mxu1 %v2736_v8 }
0x1857   :  { %2476 = vmatpush3.bf16.msra.mxu1 %v2566_v7 }
0x1858   :  { %2477 = vmatprep.subr.bf16.mxu1 %v2736_v8 }
0x185b   :  { %2478 = vmatpush3.bf16.msra.mxu1 %v2569_v21 }
0x1921   :  { %v1738_v20 = vpop.f32.mrb[32].mxu1 }
0x1922   :  { %v2490_v43 = vadd.f32 %v3162_v14, %v1738_v20  ;;  %v2469_v44 = vpop.f32.mrb[33].mxu1 }
0x1923   :  { %v1741_v27 = vpop.f32.mrb[34].mxu1  ;;  %v2158_v44 = vld [vmem:[%s3318_s6] ss:$0 sm:$0xff] }
0x1924   :  { %2700 = vtanh.f32 %v2490_v43  ;;  %v2470_v45 = vpop.f32.mrb[35].mxu1  ;;  %v2156_v22 = vmul.f32 -1.442695, %v2490_v43 }
0x1926   :  { %2702 = vpow2.f32 %v2156_v22 }
0x192e   :  { %v2701_v46 = vpop.eup %2700 }
0x192f   :  { %1753 = vrot.lane.b32.xlu0 %v2701_v46, %s2735_s26 }
0x1930   :  { %v2703_v29 = vpop.eup %2702 }
0x1931   :  { %v1747_v47 = vadd.f32 1.0, %v2703_v29 }
0x1933   :  { %2704 = vrcp.f32 %v1747_v47 }
0x193d   :  { %v2705_v48 = vpop.eup %2704 }
0x193e   :  { %v1751_v14 = vmul.f32 %v2705_v48, %v1628_v33 }
0x19a1   :  { %v1754_v49 = vpop.permute.xlu0 %1753 }
0x19a2   :  { %v1756_v50 = vmul.f32 %v2705_v48, %v1754_v49 }
0x19a4   :  { %1758 = vrot.lane.b32.xlu1 %v1756_v50, %s2735_s26 }
0x19a8   :  { %2531 = vrot.lane.b32.xlu1 %v3072_v61, %s2738_s8  ;;  %v2552_v61 = vld [vmem:[%s3317_s5] sm:$0xff]  }
0x19a9   :  { %2253 = vmatpush3.bf16.msra.mxu0 %v2552_v61 }
0x19aa   :  { %2254 = vmatprep.subr.bf16.mxu0 %v2553_v59 }
0x19ad   :  { %2255 = vmatpush3.bf16.msra.mxu0 %v2554_v62 }
0x19ae   :  { %2256 = vmatprep.subr.bf16.mxu0 %v2555_v63 }
0x19b1   :  { %2257 = vmatpush3.bf16.msra.mxu0 %v2556_v0 }
0x19b2   :  { %2258 = vmatprep.subr.bf16.mxu0 %v2557_v2 }
0x19b5   :  { %2259 = vmatpush3.bf16.msra.mxu0 %v2558_v3 }
0x1a16   :  { %v1759_v52 = vpop.permute.xlu1 %1758 }
0x1a17   :  { %v1761_v53 = vadd.f32 %v1759_v52, %v1751_v14 }
0x1a19   :  { %2706 = vtanh.f32 %v1761_v53 }
0x1a1a   :  { %v2532_v54 = vpop.permute.xlu1 %2531 }
0x1a1b   :  { %v2534_v24 = vunpack.i.h.bf16 %v2532_v54  ;;  %v2533_v55 = vunpack.i.l.bf16 %v2532_v54 }
0x1a1d   :  { %233 = vst.msk [vmem:[#allocation2] sm:$0x3] %vm232_vm0, %v2533_v55  ;;  %1077 = vst.msk [vmem:[#allocation2 + $0x2] sm:$0x3] %vm232_vm0, %v2534_v24 }
0x1a23   :  { %v2707_v60 = vpop.eup %2706 }
0x1a24   :  { %1764 = vrot.lane.b32.xlu0 %v2707_v60, %s2735_s26 }
0x1a28   :  { %2536 = vrot.lane.b32.xlu0 %v3122_v25, %s2740_s21  ;;  %v2559_v25 = vld [vmem:[%s3317_s5 + $0x60] sm:$0xff]  }
0x1a29   :  { %2260 = vmatprep.subr.bf16.mxu0 %v2559_v25 }
0x1a2a   :  { %2261 = vmatpush3.bf16.msra.mxu0 %v2561_v6 }
0x1a2b   :  { %2262 = vmatprep.subr.bf16.mxu0 %v2562_v5 }
0x1a2c   :  { %2541 = vrot.lane.b32.xlu0 %v2540_v41, %s2735_s26 }
0x1a2e   :  { %2263 = vmatpush3.bf16.msra.mxu0 %v2564_v4 }
0x1a2f   :  { %2264 = vmatprep.subr.bf16.mxu0 %v2565_v11 }
0x1a32   :  { %2265 = vmatpush3.bf16.msra.mxu0 %v2567_v16 }
0x1a33   :  { %2266 = vmatprep.subr.bf16.mxu0 %v2568_v17 }
0x1a36   :  { %2267 = vmatpush3.bf16.msra.mxu0 %v2570_v40 }
0x1a96   :  { %v1765_v13 = vpop.permute.xlu0 %1764 }
0x1a97   :  { %v1767_v15 = vmul.f32 %v2705_v48, %v1765_v13 }
0x1a99   :  { %vm1768_vm1 = vcmp.gt.f32.partialorder %v1767_v15, 0.5  ;;  %v1790_v33 = vrot.slane %v1767_v15, %v3065_v26 }
0x1a9a   :  { %v2157_v18 = vsel %vm1768_vm1, 1.0, %v2736_v8  ;;  %v2537_v19 = vpop.permute.xlu0 %2536 }
0x1a9b   :  { %v2539_v23 = vunpack.i.h.bf16 %v2537_v19  ;;  %v2538_v51 = vunpack.i.l.bf16 %v2537_v19  ;;  %v1778_v28 = vrot.slane %v2157_v18, %v3065_v26 }
0x1a9d   :  { %1779 = vrot.lane.b32.xlu1 %v1778_v28, %s2738_s8  ;;  %456 = vst.msk [vmem:[#allocation2] sm:$0x3] %vm455_vm4, %v2538_v51  ;;  %1287 = vst.msk [vmem:[#allocation2 + $0x2] sm:$0x3] %vm455_vm4, %v2539_v23 }
0x1a9e   :  { %v2542_v32 = vpop.permute.xlu0 %2541  ;;  %656 = vst.msk [vmem:[#allocation2] sm:$0x3] %vm655_vm5, %v2114_v9  ;;  %1486 = vst.msk [vmem:[#allocation2 + $0x2] sm:$0x3] %vm655_vm5, %v2146_v31 }
0x1a9f   :  { %v2544_v34 = vunpack.i.h.bf16 %v2542_v32  ;;  %v2543_v35 = vunpack.i.l.bf16 %v2542_v32 }
0x1aa1   :  { %1791 = vrot.lane.b32.xlu1 %v1790_v33, %s2740_s21  ;;  %867 = vst.msk [vmem:[#allocation2] sm:$0x3] %vm866_vm6, %v2543_v35  ;;  %1649 = vst.msk [vmem:[#allocation2 + $0x2] sm:$0x3] %vm866_vm6, %v2544_v34  ;;  %s2741_s21 = smov [#allocation3]  }
0x1aa2   :  { %s2078_s27 = sshll.u32 %s2741_s21, 4  ;;  %s2079_s27 = int_to_ptr.vmem [resolvable:$true] %s2078_s27 }
0x1aa3   :  { %s2711_s28 = scalar_lea.vmem %s2079_s27, 32  ;;  %p2716_p1 = scmp.lt.s32.totalorder %s2079_s27, %s2079_s27 }
0x1aa4   :  { %p2712_p0 = scmp.ne.s32.totalorder %s2079_s27, %s2711_s28  ;;  %p2717_p2 = scmp.lt.s32.totalorder %s2711_s28, %s2711_s28 }
0x1aa6   :  { %p2718_p3 = por %p2717_p2, %p2716_p1 }
0x1aa8   :  { %p2719_p4 = pnand %p2718_p3, %p2712_p0 }
0x1b0f   :  { %v1780_v8 = vpop.permute.xlu1 %1779 }
0x1b10   :  { %1782 = vst.msk [vmem:[#allocation2 + $0x4] sm:$0x3] %vm232_vm0, %v1780_v8 }
0x1b13   :  { %v1792_v36 = vpop.permute.xlu1 %1791 }
0x1b14   :  { %1794 = vst.msk [vmem:[#allocation2 + $0x4] sm:$0x3] %vm455_vm4, %v1792_v36 }
0x1b1b   :  { %v1795_v12 = vld [vmem:[#allocation2] sm:$0x3f] }
0x1b1c   :  { %v1797_v57 = vcombine.high %v1795_v12, %v1795_v12  ;;  %v1804_v58 = vrot.slane %v1795_v12, %v3065_v26 }
0x1b1e   :  { %v1811_v37 = vrot.slane %v1797_v57, %v3065_v26  ;;  %v1812_v38 = vcombine.high %v1804_v58, %v1804_v58  ;;  %v1816_v42 = vpack.c.bf16 %v1804_v58, %v1804_v58 }
0x1b20   :  { %v1817_v39 = vpack.c.bf16 %v1812_v38, %v1812_v38  ;;  %v1818_v41 = vpack.c.bf16 %v1811_v37, %v1811_v37 }
0x1b22   :  { %2022 = vmatprep.mubr.bf16.mxu0 %v1817_v39  ;;  %2480 = vmatmul.mubr.msk.bf16.vlgmr.msra.gmra.mrb[36].mxu1 %vm1986_vm7, %v1818_v41 }
0x1b23   :  { %2023 = vmatmul.mubr.bf16.vlgmr.msra.gmra.mrb[28].mxu0 %v1816_v42 }
0x1bf5   :  { %v2064_v30 = vpop.f32.mrb[36].mxu1 }
0x1bf6   :  { %v2268_v20 = vpop.f32.mrb[28].mxu0  ;;  %v2481_v43 = vpop.f32.mrb[37].mxu1 }
0x1bf7   :  { %v2269_v27 = vpop.f32.mrb[29].mxu0  ;;  %v2067_v45 = vpop.f32.mrb[38].mxu1 }
0x1bf8   :  { %v2270_v46 = vadd.f32 %v2269_v27, %v2268_v20  ;;  %v2271_v22 = vpop.f32.mrb[30].mxu0  ;;  %v2482_v26 = vpop.f32.mrb[39].mxu1 }
0x1bf9   :  { %v2272_v29 = vpop.f32.mrb[31].mxu0 }
0x1bfa   :  { %v2025_v47 = vadd.f32 %v2270_v46, %v2158_v44 }
0x1bfc   :  { %v2065_v48 = vadd.f32 %v2064_v30, %v2025_v47 }
0x1bfe   :  { %2071 = vst.msk [vmem:[#allocation3] sm:$0x3] %vm2070_vm8, %v2065_v48 }
0x1bff   :  { %2722 = shalt.err (!%p2719_p4)
}
0x1c00   :  { %s2723_s30 = scalar_lea.hbm %s3319_s7, 32 }
0x1c01   :  { %p2724_p5 = scmp.ne.s32.totalorder %s3319_s7, %s2723_s30  ;;  %p2727_p6 = scmp.lt.u32.totalorder %s2723_s30, %s3319_s7 }
0x1c03   :  { %p2729_p7 = pnand %p2727_p6, %p2724_p5 }
0x1c05   :  { %2732 = shalt.err (!%p2729_p7)
}
0x1c06   :  { %2081 = dma.vmem_to_hbm [thread:$0]  %s2079_s27, 32, %s3319_s7, [#allocation4]  }
0x1c07   :  { %2733 = dma.done.wait [#allocation4], 32  }
0x1c08   :  { %2734 = vsyncadd [#allocation4], 4294967264 }
0x1c09   :  { %2085 = vsyncpa [#allocation4], 1 }

</bundles_post_ra>
